<compile_context>
chip_gen: v7x
topology: tpu7x:2x2x1
jax: 0.10.0
libtpu: 0.0.40
codegen_flags: <defaults>
</compile_context>

<pallas_src>
import jax
import jax.numpy as jnp
from jax.experimental import pallas as pl
from jax.experimental.pallas import tpu as pltpu

HIDDEN = 64
INPUT_SIZE = 1
OUT_FEATURES = 2


def rnn_v1_kernel(gi_ref, wbig_ref, fc_ref, out_ref):
    """Fused 2-layer GRU recurrence (one-step skewed) + fc.

    gi_ref  : (T+1, B, 8H) per-step slab, 128-lane-aligned groups
              [gi0_r+b | b1_r] [gi0_z+b | b1_z] [bhh0_n | bhh1_n] [gi0_n+bih0_n | bih1_n]
    wbig_ref: (2H, 8H) fused hidden->gates weight, matching column layout
              [gh0_r | gi1_r+gh1_r] [gh0_z | gi1_z+gh1_z] [gh0_n | gh1_n] [0 | gi1_n]
    fc_ref  : (2H+8, 2H) packed fc: rows 0:2H = [0 ; fc_w^T] lane-padded, row 2H = fc_b.
    out_ref : (B, 2H) lane-dense output; caller slices [:, :OUT_FEATURES].
    """
    T_plus_1, B, _ = gi_ref.shape
    H = HIDDEN
    G2 = 2 * H                                     # 128-lane group width

    wbig = wbig_ref[...]                           # (2H, 8H) loop-invariant RHS
    # lane mask selecting the layer-0 half of hcat (used only at s == 0)
    l0_mask = jax.lax.broadcasted_iota(jnp.int32, (B, G2), 1) < H

    # hcat = [h0 | h1] in one 128-lane group; no per-step concat / rotate.
    hcat = jnp.zeros((B, G2), jnp.float32)

    # Skewed, fully unrolled recurrence: iteration s runs GRU layer 0 at time s
    # (lanes 0:H of every group) and GRU layer 1 at time s-1 (lanes H:2H) off the
    # SAME fused matmul and the SAME full-lane gate math.
    # TODO(synk): hold `wbig` resident in the MXU across the unrolled loop with
    # pltpu.matmul_push_rhs / matmul_acc_lhs / matmul_pop once verified against the
    # bundle dump (the (2H,8H) RHS spans multiple MXU tiles); for now rely on Mosaic
    # hoisting the loop-invariant weight push.
    # TODO(synk): for long sequences switch to a time-blocked grid (gi BlockSpec over
    # time, "arbitrary" axis, hcat in VMEM scratch) to bound compile time & VMEM.
    for s in range(T_plus_1):
        gi = gi_ref[s]                             # (B, 8H), all biases pre-folded
        if s == 0:
            pre = gi                               # hcat == 0  =>  matmul == 0
        else:
            g = jnp.dot(hcat, wbig, preferred_element_type=jnp.float32)   # (B, 8H)
            pre = g + gi
        rz = jax.nn.sigmoid(pre[:, :2 * G2])       # [r0|r1 , z0|z1], aligned slices
        r = rz[:, :G2]
        z = rz[:, G2:2 * G2]
        n = jnp.tanh(pre[:, 3 * G2:4 * G2] + r * pre[:, 2 * G2:3 * G2])   # [n0|n1]
        upd = (1.0 - z) * n + z * hcat             # single full-lane state update
        if s == 0:
            # layer 1 has not run yet at s == 0: keep its half of the state at 0
            hcat = jnp.where(l0_mask, upd, 0.0)
        else:
            hcat = upd

    # hcat lanes H:2H now hold h1 at the last timestep; lanes 0:H hold a discarded
    # layer-0 value that only hits zero rows of the packed fc weight.
    wfc = fc_ref[:G2, :]                           # (2H, 2H), rows 0:H are zero
    bfc = fc_ref[G2:G2 + 1, :]                     # (1, 2H)
    out_ref[...] = jnp.dot(hcat, wfc, preferred_element_type=jnp.float32) + bfc


def prepare_params(params):
    """One-time packing of the module parameters into kernel-ready constants."""
    f32 = jnp.float32
    H = HIDDEN
    w_ih0 = params["w_ih_l0"].astype(f32)[:, 0]      # (3H,)  input_size == 1
    w_hh0_t = params["w_hh_l0"].T.astype(f32)        # (H, 3H)
    w_ih1_t = params["w_ih_l1"].T.astype(f32)        # (H, 3H)
    w_hh1_t = params["w_hh_l1"].T.astype(f32)        # (H, 3H)
    b_ih0 = params["b_ih_l0"].astype(f32)
    b_hh0 = params["b_hh_l0"].astype(f32)
    b_ih1 = params["b_ih_l1"].astype(f32)
    b_hh1 = params["b_hh_l1"].astype(f32)

    zH = jnp.zeros((H,), f32)
    # x-coefficient per lane of the 8H-wide slab (only layer-0 input lanes nonzero)
    coef = jnp.concatenate([w_ih0[:H], zH,                 # r group
                            w_ih0[H:2 * H], zH,            # z group
                            zH, zH,                        # n-hidden group (bias only)
                            w_ih0[2 * H:], zH])            # n-input group
    # constant per-lane bias of the slab (all GRU biases folded here)
    bias = jnp.concatenate([
        b_ih0[:H] + b_hh0[:H],             b_ih1[:H] + b_hh1[:H],
        b_ih0[H:2 * H] + b_hh0[H:2 * H],   b_ih1[H:2 * H] + b_hh1[H:2 * H],
        b_hh0[2 * H:],                     b_hh1[2 * H:],
        b_ih0[2 * H:],                     b_ih1[2 * H:]])

    ZH = jnp.zeros((H, H), f32)
    # rows 0:H multiply h0 (lanes 0:H of hcat), rows H:2H multiply h1.
    top = jnp.concatenate([w_hh0_t[:, :H],       w_ih1_t[:, :H],
                           w_hh0_t[:, H:2 * H],  w_ih1_t[:, H:2 * H],
                           w_hh0_t[:, 2 * H:],   ZH,
                           ZH,                   w_ih1_t[:, 2 * H:]], axis=1)
    bot = jnp.concatenate([ZH, w_hh1_t[:, :H],
                           ZH, w_hh1_t[:, H:2 * H],
                           ZH, w_hh1_t[:, 2 * H:],
                           ZH, ZH], axis=1)
    w_big = jnp.concatenate([top, bot], axis=0)            # (2H, 8H)

    # packed lane-dense fc slab: rows 0:H zero (under the discarded layer-0 lanes),
    # rows H:2H = fc_w^T lane-padded to 2H cols, row 2H = fc_b lane-padded.
    wfc_pad = jnp.zeros((2 * H, 2 * H), f32)
    wfc_pad = wfc_pad.at[H:, :OUT_FEATURES].set(params["fc_w"].T.astype(f32))
    bfc_pad = jnp.zeros((8, 2 * H), f32).at[0, :OUT_FEATURES].set(
        params["fc_b"].astype(f32))
    fc_slab = jnp.concatenate([wfc_pad, bfc_pad], axis=0)  # (2H+8, 2H)

    return {"coef": coef, "bias": bias, "w_big": w_big, "fc_slab": fc_slab}


@jax.jit
def rnn_v1_forward(x, prepped):
    """x: (B, T, 1) float32 (batch_first, like the PyTorch module). Returns (B, 2)."""
    B, T, _ = x.shape
    H = HIDDEN
    # time-major scalar input plus one extra (ignored) step for the skew tail
    x_tb = jnp.transpose(x[..., 0], (1, 0)).astype(jnp.float32)          # (T, B)
    x_ext = jnp.concatenate([x_tb, jnp.zeros((1, B), jnp.float32)], axis=0)
    # per-step slab: hoisted K=1 layer-0 input projection (scalar * row) with ALL
    # biases folded; constant layer-1 biases replicated per step.
    gi = (x_ext[:, :, None] * prepped["coef"][None, None, :]
          + prepped["bias"][None, None, :])                              # (T+1, B, 8H)

    vmem = pl.BlockSpec(memory_space=pltpu.MemorySpace.VMEM)
    out = pl.pallas_call(
        rnn_v1_kernel,
        out_shape=jax.ShapeDtypeStruct((B, 2 * H), jnp.float32),
        in_specs=[vmem, vmem, vmem],
        out_specs=vmem,
    )(gi, prepped["w_big"], prepped["fc_slab"])
    return out[:, :OUT_FEATURES]


def init_params(key):
    """Deterministic init matching the PyTorch module's parameter shapes."""
    ks = jax.random.split(key, 10)
    k_gru = 1.0 / jnp.sqrt(HIDDEN)
    k_fc = 1.0 / jnp.sqrt(HIDDEN)
    u = lambda k, shape, bound: jax.random.uniform(k, shape, jnp.float32, -bound, bound)
    return {
        "w_ih_l0": u(ks[0], (3 * HIDDEN, INPUT_SIZE), k_gru),
        "w_hh_l0": u(ks[1], (3 * HIDDEN, HIDDEN), k_gru),
        "b_ih_l0": u(ks[2], (3 * HIDDEN,), k_gru),
        "b_hh_l0": u(ks[3], (3 * HIDDEN,), k_gru),
        "w_ih_l1": u(ks[4], (3 * HIDDEN, HIDDEN), k_gru),
        "w_hh_l1": u(ks[5], (3 * HIDDEN, HIDDEN), k_gru),
        "b_ih_l1": u(ks[6], (3 * HIDDEN,), k_gru),
        "b_hh_l1": u(ks[7], (3 * HIDDEN,), k_gru),
        "fc_w": u(ks[8], (OUT_FEATURES, HIDDEN), k_fc),
        "fc_b": u(ks[9], (OUT_FEATURES,), k_fc),
    }


def reference_forward(x, params):
    """Pure-JAX reference of the same eval-mode forward (for correctness check)."""
    def cell(x_t, h, w_ih, w_hh, b_ih, b_hh):
        gi = x_t @ w_ih.T + b_ih
        gh = h @ w_hh.T + b_hh
        i_r, i_z, i_n = jnp.split(gi, 3, axis=-1)
        h_r, h_z, h_n = jnp.split(gh, 3, axis=-1)
        r = jax.nn.sigmoid(i_r + h_r)
        z = jax.nn.sigmoid(i_z + h_z)
        n = jnp.tanh(i_n + r * h_n)
        return (1.0 - z) * n + z * h

    B, T, _ = x.shape
    h0 = jnp.zeros((B, HIDDEN), jnp.float32)
    h1 = jnp.zeros((B, HIDDEN), jnp.float32)
    for t in range(T):
        h0 = cell(x[:, t, :], h0, params["w_ih_l0"], params["w_hh_l0"],
                  params["b_ih_l0"], params["b_hh_l0"])
        h1 = cell(h0, h1, params["w_ih_l1"], params["w_hh_l1"],
                  params["b_ih_l1"], params["b_hh_l1"])
    return h1 @ params["fc_w"].T + params["fc_b"]


if __name__ == "__main__":
    key = jax.random.PRNGKey(0)
    k_param, k_x = jax.random.split(key)
    params = init_params(k_param)
    prepped = prepare_params(params)          # one-time parameter packing

    B, T = 2, 8
    x = jax.random.normal(k_x, (B, T, INPUT_SIZE), jnp.float32)

    out = rnn_v1_forward(x, prepped)
    out = jax.block_until_ready(out)

    ref = reference_forward(x, params)
    assert out.shape == (B, OUT_FEATURES)
    # slightly looser tol: fused matmul / folded biases change f32 accumulation order
    assert jnp.allclose(out, ref, atol=1e-4, rtol=1e-4), (out, ref)

    print("KERNEL_OK")
</pallas_src>

<mosaic_0001>
module attributes {stable_mosaic.version = 11 : i64} {
  func.func @rnn_v1_kernel(%arg0: memref<9x2x512xf32, #tpu.memory_space<vmem>>, %arg1: memref<128x512xf32, #tpu.memory_space<vmem>>, %arg2: memref<136x128xf32, #tpu.memory_space<vmem>>, %arg3: memref<2x128xf32, #tpu.memory_space<vmem>>) attributes {dimension_semantics = [], scalar_prefetch = 0 : i64, scratch_operands = 0 : i64, tpu.core_type = #tpu.core_type<tc>} {
    %c0 = arith.constant 0 : index
    %c0_0 = arith.constant 0 : index
    %0 = vector.load %arg1[%c0, %c0_0] : memref<128x512xf32, #tpu.memory_space<vmem>>, vector<128x512xf32>
    %1 = tpu.iota {dimensions = array<i32: 1>} : vector<2x128xi32>
    %c64_i32 = arith.constant 64 : i32
    %2 = vector.broadcast %c64_i32 : i32 to vector<2x128xi32>
    %3 = arith.cmpi slt, %1, %2 : vector<2x128xi32>
    %cst = arith.constant 0.000000e+00 : f32
    %4 = vector.broadcast %cst : f32 to vector<2x128xf32>
    %c0_1 = arith.constant 0 : index
    %c0_2 = arith.constant 0 : index
    %c0_3 = arith.constant 0 : index
    %5 = vector.load %arg0[%c0_1, %c0_2, %c0_3] : memref<9x2x512xf32, #tpu.memory_space<vmem>>, vector<1x2x512xf32>
    %6 = vector.shape_cast %5 : vector<1x2x512xf32> to vector<2x512xf32>
    %7 = vector.extract_strided_slice %6 {offsets = [0, 0], sizes = [2, 256], strides = [1, 1]} : vector<2x512xf32> to vector<2x256xf32>
    %8 = arith.negf %7 : vector<2x256xf32>
    %9 = math.exp %8 : vector<2x256xf32>
    %cst_4 = arith.constant 1.000000e+00 : f32
    %10 = vector.broadcast %cst_4 : f32 to vector<2x256xf32>
    %11 = arith.addf %10, %9 : vector<2x256xf32>
    %12 = arith.divf %10, %11 : vector<2x256xf32>
    %13 = vector.extract_strided_slice %12 {offsets = [0, 0], sizes = [2, 128], strides = [1, 1]} : vector<2x256xf32> to vector<2x128xf32>
    %14 = vector.extract_strided_slice %12 {offsets = [0, 128], sizes = [2, 128], strides = [1, 1]} : vector<2x256xf32> to vector<2x128xf32>
    %15 = vector.extract_strided_slice %6 {offsets = [0, 384], sizes = [2, 128], strides = [1, 1]} : vector<2x512xf32> to vector<2x128xf32>
    %16 = vector.extract_strided_slice %6 {offsets = [0, 256], sizes = [2, 128], strides = [1, 1]} : vector<2x512xf32> to vector<2x128xf32>
    %17 = arith.mulf %13, %16 : vector<2x128xf32>
    %18 = arith.addf %15, %17 : vector<2x128xf32>
    %19 = math.tanh %18 : vector<2x128xf32>
    %cst_5 = arith.constant 1.000000e+00 : f32
    %20 = vector.broadcast %cst_5 : f32 to vector<2x128xf32>
    %21 = arith.subf %20, %14 : vector<2x128xf32>
    %22 = arith.mulf %21, %19 : vector<2x128xf32>
    %23 = arith.mulf %14, %4 : vector<2x128xf32>
    %24 = arith.addf %22, %23 : vector<2x128xf32>
    %cst_6 = arith.constant 0.000000e+00 : f32
    %25 = vector.broadcast %cst_6 : f32 to vector<2x128xf32>
    %26 = arith.select %3, %24, %25 : vector<2x128xi1>, vector<2x128xf32>
    %c1 = arith.constant 1 : index
    %c0_7 = arith.constant 0 : index
    %c0_8 = arith.constant 0 : index
    %27 = vector.load %arg0[%c1, %c0_7, %c0_8] : memref<9x2x512xf32, #tpu.memory_space<vmem>>, vector<1x2x512xf32>
    %28 = vector.shape_cast %27 : vector<1x2x512xf32> to vector<2x512xf32>
    %cst_9 = arith.constant dense<0.000000e+00> : vector<2x512xf32>
    %29 = tpu.matmul %26, %0, %cst_9 {dimension_numbers = #tpu.dot_dimension_numbers<[1], [0], [0], [1], [0, 0, 1, 1], [], []>} : vector<2x128xf32>, vector<128x512xf32>, vector<2x512xf32> -> vector<2x512xf32>
    %30 = arith.addf %29, %28 : vector<2x512xf32>
    %31 = vector.extract_strided_slice %30 {offsets = [0, 0], sizes = [2, 256], strides = [1, 1]} : vector<2x512xf32> to vector<2x256xf32>
    %32 = arith.negf %31 : vector<2x256xf32>
    %33 = math.exp %32 : vector<2x256xf32>
    %cst_10 = arith.constant 1.000000e+00 : f32
    %34 = vector.broadcast %cst_10 : f32 to vector<2x256xf32>
    %35 = arith.addf %34, %33 : vector<2x256xf32>
    %36 = arith.divf %34, %35 : vector<2x256xf32>
    %37 = vector.extract_strided_slice %36 {offsets = [0, 0], sizes = [2, 128], strides = [1, 1]} : vector<2x256xf32> to vector<2x128xf32>
    %38 = vector.extract_strided_slice %36 {offsets = [0, 128], sizes = [2, 128], strides = [1, 1]} : vector<2x256xf32> to vector<2x128xf32>
    %39 = vector.extract_strided_slice %30 {offsets = [0, 384], sizes = [2, 128], strides = [1, 1]} : vector<2x512xf32> to vector<2x128xf32>
    %40 = vector.extract_strided_slice %30 {offsets = [0, 256], sizes = [2, 128], strides = [1, 1]} : vector<2x512xf32> to vector<2x128xf32>
    %41 = arith.mulf %37, %40 : vector<2x128xf32>
    %42 = arith.addf %39, %41 : vector<2x128xf32>
    %43 = math.tanh %42 : vector<2x128xf32>
    %cst_11 = arith.constant 1.000000e+00 : f32
    %44 = vector.broadcast %cst_11 : f32 to vector<2x128xf32>
    %45 = arith.subf %44, %38 : vector<2x128xf32>
    %46 = arith.mulf %45, %43 : vector<2x128xf32>
    %47 = arith.mulf %38, %26 : vector<2x128xf32>
    %48 = arith.addf %46, %47 : vector<2x128xf32>
    %c2 = arith.constant 2 : index
    %c0_12 = arith.constant 0 : index
    %c0_13 = arith.constant 0 : index
    %49 = vector.load %arg0[%c2, %c0_12, %c0_13] : memref<9x2x512xf32, #tpu.memory_space<vmem>>, vector<1x2x512xf32>
    %50 = vector.shape_cast %49 : vector<1x2x512xf32> to vector<2x512xf32>
    %cst_14 = arith.constant dense<0.000000e+00> : vector<2x512xf32>
    %51 = tpu.matmul %48, %0, %cst_14 {dimension_numbers = #tpu.dot_dimension_numbers<[1], [0], [0], [1], [0, 0, 1, 1], [], []>} : vector<2x128xf32>, vector<128x512xf32>, vector<2x512xf32> -> vector<2x512xf32>
    %52 = arith.addf %51, %50 : vector<2x512xf32>
    %53 = vector.extract_strided_slice %52 {offsets = [0, 0], sizes = [2, 256], strides = [1, 1]} : vector<2x512xf32> to vector<2x256xf32>
    %54 = arith.negf %53 : vector<2x256xf32>
    %55 = math.exp %54 : vector<2x256xf32>
    %cst_15 = arith.constant 1.000000e+00 : f32
    %56 = vector.broadcast %cst_15 : f32 to vector<2x256xf32>
    %57 = arith.addf %56, %55 : vector<2x256xf32>
    %58 = arith.divf %56, %57 : vector<2x256xf32>
    %59 = vector.extract_strided_slice %58 {offsets = [0, 0], sizes = [2, 128], strides = [1, 1]} : vector<2x256xf32> to vector<2x128xf32>
    %60 = vector.extract_strided_slice %58 {offsets = [0, 128], sizes = [2, 128], strides = [1, 1]} : vector<2x256xf32> to vector<2x128xf32>
    %61 = vector.extract_strided_slice %52 {offsets = [0, 384], sizes = [2, 128], strides = [1, 1]} : vector<2x512xf32> to vector<2x128xf32>
    %62 = vector.extract_strided_slice %52 {offsets = [0, 256], sizes = [2, 128], strides = [1, 1]} : vector<2x512xf32> to vector<2x128xf32>
    %63 = arith.mulf %59, %62 : vector<2x128xf32>
    %64 = arith.addf %61, %63 : vector<2x128xf32>
    %65 = math.tanh %64 : vector<2x128xf32>
    %cst_16 = arith.constant 1.000000e+00 : f32
    %66 = vector.broadcast %cst_16 : f32 to vector<2x128xf32>
    %67 = arith.subf %66, %60 : vector<2x128xf32>
    %68 = arith.mulf %67, %65 : vector<2x128xf32>
    %69 = arith.mulf %60, %48 : vector<2x128xf32>
    %70 = arith.addf %68, %69 : vector<2x128xf32>
    %c3 = arith.constant 3 : index
    %c0_17 = arith.constant 0 : index
    %c0_18 = arith.constant 0 : index
    %71 = vector.load %arg0[%c3, %c0_17, %c0_18] : memref<9x2x512xf32, #tpu.memory_space<vmem>>, vector<1x2x512xf32>
    %72 = vector.shape_cast %71 : vector<1x2x512xf32> to vector<2x512xf32>
    %cst_19 = arith.constant dense<0.000000e+00> : vector<2x512xf32>
    %73 = tpu.matmul %70, %0, %cst_19 {dimension_numbers = #tpu.dot_dimension_numbers<[1], [0], [0], [1], [0, 0, 1, 1], [], []>} : vector<2x128xf32>, vector<128x512xf32>, vector<2x512xf32> -> vector<2x512xf32>
    %74 = arith.addf %73, %72 : vector<2x512xf32>
    %75 = vector.extract_strided_slice %74 {offsets = [0, 0], sizes = [2, 256], strides = [1, 1]} : vector<2x512xf32> to vector<2x256xf32>
    %76 = arith.negf %75 : vector<2x256xf32>
    %77 = math.exp %76 : vector<2x256xf32>
    %cst_20 = arith.constant 1.000000e+00 : f32
    %78 = vector.broadcast %cst_20 : f32 to vector<2x256xf32>
    %79 = arith.addf %78, %77 : vector<2x256xf32>
    %80 = arith.divf %78, %79 : vector<2x256xf32>
    %81 = vector.extract_strided_slice %80 {offsets = [0, 0], sizes = [2, 128], strides = [1, 1]} : vector<2x256xf32> to vector<2x128xf32>
    %82 = vector.extract_strided_slice %80 {offsets = [0, 128], sizes = [2, 128], strides = [1, 1]} : vector<2x256xf32> to vector<2x128xf32>
    %83 = vector.extract_strided_slice %74 {offsets = [0, 384], sizes = [2, 128], strides = [1, 1]} : vector<2x512xf32> to vector<2x128xf32>
    %84 = vector.extract_strided_slice %74 {offsets = [0, 256], sizes = [2, 128], strides = [1, 1]} : vector<2x512xf32> to vector<2x128xf32>
    %85 = arith.mulf %81, %84 : vector<2x128xf32>
    %86 = arith.addf %83, %85 : vector<2x128xf32>
    %87 = math.tanh %86 : vector<2x128xf32>
    %cst_21 = arith.constant 1.000000e+00 : f32
    %88 = vector.broadcast %cst_21 : f32 to vector<2x128xf32>
    %89 = arith.subf %88, %82 : vector<2x128xf32>
    %90 = arith.mulf %89, %87 : vector<2x128xf32>
    %91 = arith.mulf %82, %70 : vector<2x128xf32>
    %92 = arith.addf %90, %91 : vector<2x128xf32>
    %c4 = arith.constant 4 : index
    %c0_22 = arith.constant 0 : index
    %c0_23 = arith.constant 0 : index
    %93 = vector.load %arg0[%c4, %c0_22, %c0_23] : memref<9x2x512xf32, #tpu.memory_space<vmem>>, vector<1x2x512xf32>
    %94 = vector.shape_cast %93 : vector<1x2x512xf32> to vector<2x512xf32>
    %cst_24 = arith.constant dense<0.000000e+00> : vector<2x512xf32>
    %95 = tpu.matmul %92, %0, %cst_24 {dimension_numbers = #tpu.dot_dimension_numbers<[1], [0], [0], [1], [0, 0, 1, 1], [], []>} : vector<2x128xf32>, vector<128x512xf32>, vector<2x512xf32> -> vector<2x512xf32>
    %96 = arith.addf %95, %94 : vector<2x512xf32>
    %97 = vector.extract_strided_slice %96 {offsets = [0, 0], sizes = [2, 256], strides = [1, 1]} : vector<2x512xf32> to vector<2x256xf32>
    %98 = arith.negf %97 : vector<2x256xf32>
    %99 = math.exp %98 : vector<2x256xf32>
    %cst_25 = arith.constant 1.000000e+00 : f32
    %100 = vector.broadcast %cst_25 : f32 to vector<2x256xf32>
    %101 = arith.addf %100, %99 : vector<2x256xf32>
    %102 = arith.divf %100, %101 : vector<2x256xf32>
    %103 = vector.extract_strided_slice %102 {offsets = [0, 0], sizes = [2, 128], strides = [1, 1]} : vector<2x256xf32> to vector<2x128xf32>
    %104 = vector.extract_strided_slice %102 {offsets = [0, 128], sizes = [2, 128], strides = [1, 1]} : vector<2x256xf32> to vector<2x128xf32>
    %105 = vector.extract_strided_slice %96 {offsets = [0, 384], sizes = [2, 128], strides = [1, 1]} : vector<2x512xf32> to vector<2x128xf32>
    %106 = vector.extract_strided_slice %96 {offsets = [0, 256], sizes = [2, 128], strides = [1, 1]} : vector<2x512xf32> to vector<2x128xf32>
    %107 = arith.mulf %103, %106 : vector<2x128xf32>
    %108 = arith.addf %105, %107 : vector<2x128xf32>
    %109 = math.tanh %108 : vector<2x128xf32>
    %cst_26 = arith.constant 1.000000e+00 : f32
    %110 = vector.broadcast %cst_26 : f32 to vector<2x128xf32>
    %111 = arith.subf %110, %104 : vector<2x128xf32>
    %112 = arith.mulf %111, %109 : vector<2x128xf32>
    %113 = arith.mulf %104, %92 : vector<2x128xf32>
    %114 = arith.addf %112, %113 : vector<2x128xf32>
    %c5 = arith.constant 5 : index
    %c0_27 = arith.constant 0 : index
    %c0_28 = arith.constant 0 : index
    %115 = vector.load %arg0[%c5, %c0_27, %c0_28] : memref<9x2x512xf32, #tpu.memory_space<vmem>>, vector<1x2x512xf32>
    %116 = vector.shape_cast %115 : vector<1x2x512xf32> to vector<2x512xf32>
    %cst_29 = arith.constant dense<0.000000e+00> : vector<2x512xf32>
    %117 = tpu.matmul %114, %0, %cst_29 {dimension_numbers = #tpu.dot_dimension_numbers<[1], [0], [0], [1], [0, 0, 1, 1], [], []>} : vector<2x128xf32>, vector<128x512xf32>, vector<2x512xf32> -> vector<2x512xf32>
    %118 = arith.addf %117, %116 : vector<2x512xf32>
    %119 = vector.extract_strided_slice %118 {offsets = [0, 0], sizes = [2, 256], strides = [1, 1]} : vector<2x512xf32> to vector<2x256xf32>
    %120 = arith.negf %119 : vector<2x256xf32>
    %121 = math.exp %120 : vector<2x256xf32>
    %cst_30 = arith.constant 1.000000e+00 : f32
    %122 = vector.broadcast %cst_30 : f32 to vector<2x256xf32>
    %123 = arith.addf %122, %121 : vector<2x256xf32>
    %124 = arith.divf %122, %123 : vector<2x256xf32>
    %125 = vector.extract_strided_slice %124 {offsets = [0, 0], sizes = [2, 128], strides = [1, 1]} : vector<2x256xf32> to vector<2x128xf32>
    %126 = vector.extract_strided_slice %124 {offsets = [0, 128], sizes = [2, 128], strides = [1, 1]} : vector<2x256xf32> to vector<2x128xf32>
    %127 = vector.extract_strided_slice %118 {offsets = [0, 384], sizes = [2, 128], strides = [1, 1]} : vector<2x512xf32> to vector<2x128xf32>
    %128 = vector.extract_strided_slice %118 {offsets = [0, 256], sizes = [2, 128], strides = [1, 1]} : vector<2x512xf32> to vector<2x128xf32>
    %129 = arith.mulf %125, %128 : vector<2x128xf32>
    %130 = arith.addf %127, %129 : vector<2x128xf32>
    %131 = math.tanh %130 : vector<2x128xf32>
    %cst_31 = arith.constant 1.000000e+00 : f32
    %132 = vector.broadcast %cst_31 : f32 to vector<2x128xf32>
    %133 = arith.subf %132, %126 : vector<2x128xf32>
    %134 = arith.mulf %133, %131 : vector<2x128xf32>
    %135 = arith.mulf %126, %114 : vector<2x128xf32>
    %136 = arith.addf %134, %135 : vector<2x128xf32>
    %c6 = arith.constant 6 : index
    %c0_32 = arith.constant 0 : index
    %c0_33 = arith.constant 0 : index
    %137 = vector.load %arg0[%c6, %c0_32, %c0_33] : memref<9x2x512xf32, #tpu.memory_space<vmem>>, vector<1x2x512xf32>
    %138 = vector.shape_cast %137 : vector<1x2x512xf32> to vector<2x512xf32>
    %cst_34 = arith.constant dense<0.000000e+00> : vector<2x512xf32>
    %139 = tpu.matmul %136, %0, %cst_34 {dimension_numbers = #tpu.dot_dimension_numbers<[1], [0], [0], [1], [0, 0, 1, 1], [], []>} : vector<2x128xf32>, vector<128x512xf32>, vector<2x512xf32> -> vector<2x512xf32>
    %140 = arith.addf %139, %138 : vector<2x512xf32>
    %141 = vector.extract_strided_slice %140 {offsets = [0, 0], sizes = [2, 256], strides = [1, 1]} : vector<2x512xf32> to vector<2x256xf32>
    %142 = arith.negf %141 : vector<2x256xf32>
    %143 = math.exp %142 : vector<2x256xf32>
    %cst_35 = arith.constant 1.000000e+00 : f32
    %144 = vector.broadcast %cst_35 : f32 to vector<2x256xf32>
    %145 = arith.addf %144, %143 : vector<2x256xf32>
    %146 = arith.divf %144, %145 : vector<2x256xf32>
    %147 = vector.extract_strided_slice %146 {offsets = [0, 0], sizes = [2, 128], strides = [1, 1]} : vector<2x256xf32> to vector<2x128xf32>
    %148 = vector.extract_strided_slice %146 {offsets = [0, 128], sizes = [2, 128], strides = [1, 1]} : vector<2x256xf32> to vector<2x128xf32>
    %149 = vector.extract_strided_slice %140 {offsets = [0, 384], sizes = [2, 128], strides = [1, 1]} : vector<2x512xf32> to vector<2x128xf32>
    %150 = vector.extract_strided_slice %140 {offsets = [0, 256], sizes = [2, 128], strides = [1, 1]} : vector<2x512xf32> to vector<2x128xf32>
    %151 = arith.mulf %147, %150 : vector<2x128xf32>
    %152 = arith.addf %149, %151 : vector<2x128xf32>
    %153 = math.tanh %152 : vector<2x128xf32>
    %cst_36 = arith.constant 1.000000e+00 : f32
    %154 = vector.broadcast %cst_36 : f32 to vector<2x128xf32>
    %155 = arith.subf %154, %148 : vector<2x128xf32>
    %156 = arith.mulf %155, %153 : vector<2x128xf32>
    %157 = arith.mulf %148, %136 : vector<2x128xf32>
    %158 = arith.addf %156, %157 : vector<2x128xf32>
    %c7 = arith.constant 7 : index
    %c0_37 = arith.constant 0 : index
    %c0_38 = arith.constant 0 : index
    %159 = vector.load %arg0[%c7, %c0_37, %c0_38] : memref<9x2x512xf32, #tpu.memory_space<vmem>>, vector<1x2x512xf32>
    %160 = vector.shape_cast %159 : vector<1x2x512xf32> to vector<2x512xf32>
    %cst_39 = arith.constant dense<0.000000e+00> : vector<2x512xf32>
    %161 = tpu.matmul %158, %0, %cst_39 {dimension_numbers = #tpu.dot_dimension_numbers<[1], [0], [0], [1], [0, 0, 1, 1], [], []>} : vector<2x128xf32>, vector<128x512xf32>, vector<2x512xf32> -> vector<2x512xf32>
    %162 = arith.addf %161, %160 : vector<2x512xf32>
    %163 = vector.extract_strided_slice %162 {offsets = [0, 0], sizes = [2, 256], strides = [1, 1]} : vector<2x512xf32> to vector<2x256xf32>
    %164 = arith.negf %163 : vector<2x256xf32>
    %165 = math.exp %164 : vector<2x256xf32>
    %cst_40 = arith.constant 1.000000e+00 : f32
    %166 = vector.broadcast %cst_40 : f32 to vector<2x256xf32>
    %167 = arith.addf %166, %165 : vector<2x256xf32>
    %168 = arith.divf %166, %167 : vector<2x256xf32>
    %169 = vector.extract_strided_slice %168 {offsets = [0, 0], sizes = [2, 128], strides = [1, 1]} : vector<2x256xf32> to vector<2x128xf32>
    %170 = vector.extract_strided_slice %168 {offsets = [0, 128], sizes = [2, 128], strides = [1, 1]} : vector<2x256xf32> to vector<2x128xf32>
    %171 = vector.extract_strided_slice %162 {offsets = [0, 384], sizes = [2, 128], strides = [1, 1]} : vector<2x512xf32> to vector<2x128xf32>
    %172 = vector.extract_strided_slice %162 {offsets = [0, 256], sizes = [2, 128], strides = [1, 1]} : vector<2x512xf32> to vector<2x128xf32>
    %173 = arith.mulf %169, %172 : vector<2x128xf32>
    %174 = arith.addf %171, %173 : vector<2x128xf32>
    %175 = math.tanh %174 : vector<2x128xf32>
    %cst_41 = arith.constant 1.000000e+00 : f32
    %176 = vector.broadcast %cst_41 : f32 to vector<2x128xf32>
    %177 = arith.subf %176, %170 : vector<2x128xf32>
    %178 = arith.mulf %177, %175 : vector<2x128xf32>
    %179 = arith.mulf %170, %158 : vector<2x128xf32>
    %180 = arith.addf %178, %179 : vector<2x128xf32>
    %c8 = arith.constant 8 : index
    %c0_42 = arith.constant 0 : index
    %c0_43 = arith.constant 0 : index
    %181 = vector.load %arg0[%c8, %c0_42, %c0_43] : memref<9x2x512xf32, #tpu.memory_space<vmem>>, vector<1x2x512xf32>
    %182 = vector.shape_cast %181 : vector<1x2x512xf32> to vector<2x512xf32>
    %cst_44 = arith.constant dense<0.000000e+00> : vector<2x512xf32>
    %183 = tpu.matmul %180, %0, %cst_44 {dimension_numbers = #tpu.dot_dimension_numbers<[1], [0], [0], [1], [0, 0, 1, 1], [], []>} : vector<2x128xf32>, vector<128x512xf32>, vector<2x512xf32> -> vector<2x512xf32>
    %184 = arith.addf %183, %182 : vector<2x512xf32>
    %185 = vector.extract_strided_slice %184 {offsets = [0, 0], sizes = [2, 256], strides = [1, 1]} : vector<2x512xf32> to vector<2x256xf32>
    %186 = arith.negf %185 : vector<2x256xf32>
    %187 = math.exp %186 : vector<2x256xf32>
    %cst_45 = arith.constant 1.000000e+00 : f32
    %188 = vector.broadcast %cst_45 : f32 to vector<2x256xf32>
    %189 = arith.addf %188, %187 : vector<2x256xf32>
    %190 = arith.divf %188, %189 : vector<2x256xf32>
    %191 = vector.extract_strided_slice %190 {offsets = [0, 0], sizes = [2, 128], strides = [1, 1]} : vector<2x256xf32> to vector<2x128xf32>
    %192 = vector.extract_strided_slice %190 {offsets = [0, 128], sizes = [2, 128], strides = [1, 1]} : vector<2x256xf32> to vector<2x128xf32>
    %193 = vector.extract_strided_slice %184 {offsets = [0, 384], sizes = [2, 128], strides = [1, 1]} : vector<2x512xf32> to vector<2x128xf32>
    %194 = vector.extract_strided_slice %184 {offsets = [0, 256], sizes = [2, 128], strides = [1, 1]} : vector<2x512xf32> to vector<2x128xf32>
    %195 = arith.mulf %191, %194 : vector<2x128xf32>
    %196 = arith.addf %193, %195 : vector<2x128xf32>
    %197 = math.tanh %196 : vector<2x128xf32>
    %cst_46 = arith.constant 1.000000e+00 : f32
    %198 = vector.broadcast %cst_46 : f32 to vector<2x128xf32>
    %199 = arith.subf %198, %192 : vector<2x128xf32>
    %200 = arith.mulf %199, %197 : vector<2x128xf32>
    %201 = arith.mulf %192, %180 : vector<2x128xf32>
    %202 = arith.addf %200, %201 : vector<2x128xf32>
    %c0_47 = arith.constant 0 : index
    %c0_48 = arith.constant 0 : index
    %203 = vector.load %arg2[%c0_47, %c0_48] : memref<136x128xf32, #tpu.memory_space<vmem>>, vector<128x128xf32>
    %c128 = arith.constant 128 : index
    %c0_49 = arith.constant 0 : index
    %204 = vector.load %arg2[%c128, %c0_49] : memref<136x128xf32, #tpu.memory_space<vmem>>, vector<1x128xf32>
    %cst_50 = arith.constant dense<0.000000e+00> : vector<2x128xf32>
    %205 = tpu.matmul %202, %203, %cst_50 {dimension_numbers = #tpu.dot_dimension_numbers<[1], [0], [0], [1], [0, 0, 1, 1], [], []>} : vector<2x128xf32>, vector<128x128xf32>, vector<2x128xf32> -> vector<2x128xf32>
    %206 = vector.broadcast %204 : vector<1x128xf32> to vector<2x128xf32>
    %207 = arith.addf %205, %206 : vector<2x128xf32>
    %c0_51 = arith.constant 0 : index
    %c0_52 = arith.constant 0 : index
    %208 = vector.load %arg3[%c0_51, %c0_52] : memref<2x128xf32, #tpu.memory_space<vmem>>, vector<2x128xf32>
    tpu.vector_store %arg3[%c0_51, %c0_52], %207 {strides = array<i32>} : memref<2x128xf32, #tpu.memory_space<vmem>>, vector<2x128xf32>,
    return
  }
}

</mosaic_0001>

<bundles_post_ra>
// kernel: rnn_v1_forward.1
= control target key start
LH: loop header
LB: loop body
LE: loop exit
PB: predicated region body
PF: predicated region fallthrough
CT: control target
= control target key end

     0   :  { %8 = vsyncpa [#allocation3], 0  ;;  %s3000_s0 = inlined_call_operand.vmem [shape: f32[9,2,512], index: 0, kind: input, shape index: {}]   ;;  %s3001_s1 = inlined_call_operand.hbm [shape: f32[128,512], index: 1, kind: input, shape index: {}]   ;;  %s3002_s2 = inlined_call_operand.vmem [shape: f32[136,128], index: 2, kind: input, shape index: {}]   ;;  %s3003_s3 = inlined_call_operand.hbm [shape: f32[2,128], index: 3, kind: output, shape index: {}]  }
   0x1   :  { %9 = vsyncpa [#allocation4], 0  ;;  %s2472_s12 = smov [#allocation2]   ;;  %s2424_s16 = scalar_lea.hbm %s3001_s1, 8192 }
   0x2   :  { %s17_s13 = sshll.u32 %s2472_s12, 4  ;;  %p2425_p0 = scmp.ne.s32.totalorder %s3001_s1, %s2424_s16  ;;  %s18_s13 = int_to_ptr.vmem [resolvable:$true] %s17_s13 }
   0x3   :  { %p2428_p1 = scmp.lt.u32.totalorder %s2424_s16, %s3001_s1 }
   0x5   :  { %p2430_p2 = pnand %p2428_p1, %p2425_p0 }
   0x7   :  { %2433 = shalt.err (!%p2430_p2)
}
   0x8   :  { %s2434_s21 = scalar_lea.vmem %s18_s13, 8192  ;;  %p2439_p4 = scmp.lt.s32.totalorder %s18_s13, %s18_s13 }
   0x9   :  { %p2435_p3 = scmp.ne.s32.totalorder %s18_s13, %s2434_s21  ;;  %p2440_p5 = scmp.lt.s32.totalorder %s2434_s21, %s2434_s21 }
   0xb   :  { %p2441_p6 = por %p2440_p5, %p2439_p4 }
   0xd   :  { %p2442_p7 = pnand %p2441_p6, %p2435_p3 }
   0xf   :  { %2445 = shalt.err (!%p2442_p7)
}
  0x10   :  { %s2473_s22 = smov 512   ;;  %s2474_s23 = smov 32  }
  0x11   :  { %23 = dma.hbm_to_vmem [thread:$0]  %s3001_s1, 8192, %s18_s13, [#allocation3], %s2473_s22, %s2473_s22, %s2474_s23  }
  0x12   :  { %2468 = dma.done.wait [#allocation3], 8192  }
  0x13   :  { %2469 = vsyncadd [#allocation3], 4294959104  ;;  %v2475_v0 = vmov 0.0   ;;  %v30_v1 = vld [vmem:[#allocation2 + $0x8] sm:$0xff]  ;;  %v29_v3 = vld [vmem:[#allocation2] sm:$0xff]  ;;  %vm2478_vm1 = vmmov 0  }
  0x14   :  { %207 = vmatprep.mubr.f32.mxu0 %v2475_v0  ;;  %278 = vmatprep.mubr.f32.mxu1 %v2475_v0  ;;  %v34_v2 = vld [vmem:[#allocation2 + $0x28] sm:$0xff]  ;;  %v33_v5 = vld [vmem:[#allocation2 + $0x20] sm:$0xff]  ;;  %v32_v25 = vld [vmem:[#allocation2 + $0x18] sm:$0xff]  ;;  %s2479_s21 = smov [#allocation5]  }
  0x15   :  { %v2514_v4 = vpack.c.bf16 %v34_v2, %v30_v1  ;;  %v38_v6 = vld [vmem:[#allocation2 + $0x48] sm:$0xff]  ;;  %v2516_v8 = vpack.c.bf16 %v33_v5, %v29_v3  ;;  %v37_v10 = vld [vmem:[#allocation2 + $0x40] sm:$0xff]  ;;  %v36_v26 = vld [vmem:[#allocation2 + $0x38] sm:$0xff]  ;;  %s1697_s22 = sshll.u32 %s2479_s21, 4  ;;  %s1698_s22 = int_to_ptr.vmem [resolvable:$true] %s1697_s22 }
  0x16   :  { %v42_v7 = vld [vmem:[#allocation2 + $0x68] sm:$0xff]  ;;  %v41_v11 = vld [vmem:[#allocation2 + $0x60] sm:$0xff]  ;;  %v2533_v28 = vpack.c.bf16 %v36_v26, %v32_v25  ;;  %v31_v29 = vld [vmem:[#allocation2 + $0x10] sm:$0xff]  ;;  %s2446_s23 = scalar_lea.vmem %s1698_s22, 32  ;;  %p2451_p9 = scmp.lt.s32.totalorder %s1698_s22, %s1698_s22 }
  0x17   :  { %v2518_v9 = vpack.c.bf16 %v42_v7, %v38_v6  ;;  %v46_v12 = vld [vmem:[#allocation2 + $0x88] sm:$0xff]  ;;  %1787 = vmatprep.subr.bf16.mxu0 %v2514_v4  ;;  %v2522_v14 = vpack.c.bf16 %v41_v11, %v37_v10  ;;  %v45_v16 = vld [vmem:[#allocation2 + $0x80] sm:$0xff]  ;;  %v35_v30 = vld [vmem:[#allocation2 + $0x30] sm:$0xff]  ;;  %p2447_p8 = scmp.ne.s32.totalorder %s1698_s22, %s2446_s23  ;;  %p2452_p10 = scmp.lt.s32.totalorder %s2446_s23, %s2446_s23 }
  0x18   :  { %v50_v13 = vld [vmem:[#allocation2 + $0xa8] sm:$0xff]  ;;  %1789 = vmatpush1.bf16.msra.mxu0 %v2516_v8  ;;  %v49_v17 = vld [vmem:[#allocation2 + $0xa0] sm:$0xff]  ;;  %v2535_v33 = vpack.c.bf16 %v35_v30, %v31_v29  ;;  %1819 = vmatprep.subr.bf16.mxu1 %v2533_v28  ;;  %v40_v36 = vld [vmem:[#allocation2 + $0x58] sm:$0xff] }
  0x19   :  { %1791 = vmatprep.subr.bf16.mxu0 %v2518_v9  ;;  %v2525_v15 = vpack.c.bf16 %v50_v13, %v46_v12  ;;  %v54_v18 = vld [vmem:[#allocation2 + $0xc8] sm:$0xff]  ;;  %v2528_v20 = vpack.c.bf16 %v49_v17, %v45_v16  ;;  %v53_v21 = vld [vmem:[#allocation2 + $0xc0] sm:$0xff]  ;;  %v44_v37 = vld [vmem:[#allocation2 + $0x78] sm:$0xff]  ;;  %p2453_p11 = por %p2452_p10, %p2451_p9 }
  0x1a   :  { %v58_v19 = vld [vmem:[#allocation2 + $0xe8] sm:$0xff]  ;;  %v57_v22 = vld [vmem:[#allocation2 + $0xe0] sm:$0xff]  ;;  %v39_v38 = vld [vmem:[#allocation2 + $0x50] sm:$0xff]  ;;  %1821 = vmatpush1.bf16.msra.mxu1 %v2535_v33  ;;  %v2545_v40 = vpack.c.bf16 %v44_v37, %v40_v36 }
  0x1b   :  { %v2531_v23 = vpack.c.bf16 %v58_v19, %v54_v18  ;;  %v62_v24 = vld [vmem:[#allocation2 + $0x108] sm:$0xff]  ;;  %v61_v31 = vld [vmem:[#allocation2 + $0x100] sm:$0xff]  ;;  %v2538_v34 = vpack.c.bf16 %v57_v22, %v53_v21  ;;  %v43_v41 = vld [vmem:[#allocation2 + $0x70] sm:$0xff]  ;;  %p2454_p12 = pnand %p2453_p11, %p2447_p8 }
  0x1c   :  { %1793 = vmatpush1.bf16.msra.mxu0 %v2522_v14  ;;  %v66_v27 = vld [vmem:[#allocation2 + $0x128] sm:$0xff]  ;;  %v65_v32 = vld [vmem:[#allocation2 + $0x120] sm:$0xff]  ;;  %v48_v43 = vld [vmem:[#allocation2 + $0x98] sm:$0xff]  ;;  %v2552_v45 = vpack.c.bf16 %v43_v41, %v39_v38  ;;  %1823 = vmatprep.subr.bf16.mxu1 %v2545_v40 }
  0x1d   :  { %1795 = vmatprep.subr.bf16.mxu0 %v2525_v15  ;;  %v70_v35 = vld [vmem:[#allocation2 + $0x148] sm:$0xff]  ;;  %v2542_v39 = vpack.c.bf16 %v66_v27, %v62_v24  ;;  %v2550_v42 = vld [vmem:[%s3000_s0] sm:$0xff]  ;;  %v52_v47 = vld [vmem:[#allocation2 + $0xb8] sm:$0xff]  ;;  %v2559_v53 = vpack.c.bf16 %v65_v32, %v61_v31 }
  0x1e   :  { %v74_v44 = vld [vmem:[#allocation2 + $0x168] sm:$0xff]  ;;  %v1706_v46 = vmul.f32 -1.442695, %v2550_v42  ;;  %v47_v48 = vld [vmem:[#allocation2 + $0x90] sm:$0xff]  ;;  %v2556_v49 = vpack.c.bf16 %v52_v47, %v48_v43  ;;  %v56_v51 = vld [vmem:[#allocation2 + $0xd8] sm:$0xff]  ;;  %1825 = vmatpush1.bf16.msra.mxu1 %v2552_v45 }
  0x1f   :  { %v51_v50 = vld [vmem:[#allocation2 + $0xb0] sm:$0xff]  ;;  %v60_v52 = vld [vmem:[#allocation2 + $0xf8] sm:$0xff]  ;;  %v2562_v54 = vpack.c.bf16 %v74_v44, %v70_v35  ;;  %v69_v55 = vld [vmem:[#allocation2 + $0x140] sm:$0xff] }
  0x20   :  { %1797 = vmatpush1.bf16.msra.mxu0 %v2528_v20  ;;  %2338 = vpow2.f32 %v1706_v46  ;;  %v73_v56 = vld [vmem:[#allocation2 + $0x160] sm:$0xff]  ;;  %v78_v57 = vld [vmem:[#allocation2 + $0x188] sm:$0xff]  ;;  %v2565_v58 = vpack.c.bf16 %v51_v50, %v47_v48  ;;  %1827 = vmatprep.subr.bf16.mxu1 %v2556_v49  ;;  %v2568_v60 = vpack.c.bf16 %v60_v52, %v56_v51  ;;  %v55_v61 = vld [vmem:[#allocation2 + $0xd0] sm:$0xff]  ;;  %v104_v52 = vrot.slane %v2550_v42, 4 }
  0x21   :  { %1799 = vmatprep.subr.bf16.mxu0 %v2531_v23  ;;  %v82_v59 = vld [vmem:[#allocation2 + $0x1a8] sm:$0xff]  ;;  %v59_v62 = vld [vmem:[#allocation2 + $0xf0] sm:$0xff]  ;;  %v64_v63 = vld [vmem:[#allocation2 + $0x118] sm:$0xff]  ;;  %v2571_v2 = vpack.c.bf16 %v73_v56, %v69_v55  ;;  %v107_v56 = vrot.slane %v2550_v42, 6 }
  0x22   :  { %v68_v1 = vld [vmem:[#allocation2 + $0x138] sm:$0xff]  ;;  %v2574_v3 = vpack.c.bf16 %v82_v59, %v78_v57  ;;  %v77_v5 = vld [vmem:[#allocation2 + $0x180] sm:$0xff]  ;;  %v86_v7 = vld [vmem:[#allocation2 + $0x1c8] sm:$0xff]  ;;  %1829 = vmatpush1.bf16.msra.mxu1 %v2565_v58  ;;  %v2577_v10 = vpack.c.bf16 %v59_v62, %v55_v61 }
  0x23   :  { %v81_v6 = vld [vmem:[#allocation2 + $0x1a0] sm:$0xff]  ;;  %v90_v11 = vld [vmem:[#allocation2 + $0x1e8] sm:$0xff]  ;;  %1831 = vmatprep.subr.bf16.mxu1 %v2568_v60  ;;  %v2580_v12 = vpack.c.bf16 %v68_v1, %v64_v63  ;;  %v63_v13 = vld [vmem:[#allocation2 + $0x110] sm:$0xff]  ;;  %v93_v63 = vlaneseq }
  0x24   :  { %1801 = vmatpush1.bf16.msra.mxu0 %v2538_v34  ;;  %v67_v16 = vld [vmem:[#allocation2 + $0x130] sm:$0xff]  ;;  %v72_v17 = vld [vmem:[#allocation2 + $0x158] sm:$0xff]  ;;  %v2583_v19 = vpack.c.bf16 %v81_v6, %v77_v5  ;;  %v2586_v21 = vpack.c.bf16 %v90_v11, %v86_v7  ;;  %v85_v22 = vld [vmem:[#allocation2 + $0x1c0] sm:$0xff] }
  0x25   :  { %1803 = vmatprep.subr.bf16.mxu0 %v2542_v39  ;;  %v76_v18 = vld [vmem:[#allocation2 + $0x178] sm:$0xff]  ;;  %v89_v24 = vld [vmem:[#allocation2 + $0x1e0] sm:$0xff]  ;;  %v2589_v25 = vpack.c.bf16 %v67_v16, %v63_v13  ;;  %v71_v29 = vld [vmem:[#allocation2 + $0x150] sm:$0xff]  ;;  %v94_v5 = vand.u32 127, %v93_v63  ;;  %v2476_v16 = vmov 1983009808  }
  0x26   :  { %1833 = vmatpush1.bf16.msra.mxu1 %v2577_v10  ;;  %v2592_v27 = vpack.c.bf16 %v76_v18, %v72_v17  ;;  %v75_v30 = vld [vmem:[#allocation2 + $0x170] sm:$0xff]  ;;  %v80_v32 = vld [vmem:[#allocation2 + $0x198] sm:$0xff]  ;;  %v2595_v36 = vpack.c.bf16 %v89_v24, %v85_v22  ;;  %v124_v17 = vunpack.c.l.s4 %v2476_v16  ;;  %v127_v22 = vshrl.u32 %v93_v63, 7 }
  0x27   :  { %1835 = vmatprep.subr.bf16.mxu1 %v2580_v12  ;;  %v84_v35 = vld [vmem:[#allocation2 + $0x1b8] sm:$0xff]  ;;  %v2599_v37 = vpack.c.bf16 %v75_v30, %v71_v29  ;;  %v79_v41 = vld [vmem:[#allocation2 + $0x190] sm:$0xff]  ;;  %vm95_vm0 = vcmp.lt.s32.totalorder %v94_v5, 64 }
  0x28   :  { %1805 = vmatpush1.bf16.msra.mxu0 %v2559_v53  ;;  %v2602_v38 = vpack.c.bf16 %v84_v35, %v80_v32  ;;  %v83_v43 = vld [vmem:[#allocation2 + $0x1b0] sm:$0xff]  ;;  %v88_v44 = vld [vmem:[#allocation2 + $0x1d8] sm:$0xff]  ;;  %v125_v18 = vunpack.c.0.s8 %v124_v17 }
  0x29   :  { %1807 = vmatprep.subr.bf16.mxu0 %v2562_v54  ;;  %v92_v46 = vld [vmem:[#allocation2 + $0x1f8] sm:$0xff]  ;;  %v2606_v47 = vpack.c.bf16 %v83_v43, %v79_v41  ;;  %v87_v50 = vld [vmem:[#allocation2 + $0x1d0] sm:$0xff] }
  0x2a   :  { %v2339_v26 = vpop.eup %2338  ;;  %1837 = vmatpush1.bf16.msra.mxu1 %v2589_v25  ;;  %v2610_v48 = vpack.c.bf16 %v92_v46, %v88_v44  ;;  %v91_v51 = vld [vmem:[#allocation2 + $0x1f0] sm:$0xff]  ;;  %v2656_v24 = vsub.s32 %v125_v18, %v127_v22 }
  0x2b   :  { %v100_v31 = vadd.f32 1.0, %v2339_v26  ;;  %1839 = vmatprep.subr.bf16.mxu1 %v2592_v27  ;;  %v2614_v55 = vpack.c.bf16 %v91_v51, %v87_v50  ;;  %v1707_v26 = vld [vmem:[%s3000_s0 + $0x8] sm:$0xff] }
  0x2c   :  { %1809 = vmatpush1.bf16.msra.mxu0 %v2571_v2  ;;  %v129_v29 = vrot.slane %v1707_v26, %v2656_v24 }
  0x2d   :  { %1811 = vmatprep.subr.bf16.mxu0 %v2574_v3  ;;  %2340 = vrcp.f32 %v100_v31 }
  0x2e   :  { %1841 = vmatpush1.bf16.msra.mxu1 %v2599_v37  ;;  %v137_v30 = vcombine.high %v129_v29, %v129_v29 }
  0x2f   :  { %1843 = vmatprep.subr.bf16.mxu1 %v2602_v38 }
  0x30   :  { %1813 = vmatpush1.bf16.msra.mxu0 %v2583_v19 }
  0x31   :  { %1815 = vmatprep.subr.bf16.mxu0 %v2586_v21 }
  0x32   :  { %1845 = vmatpush1.bf16.msra.mxu1 %v2606_v47 }
  0x33   :  { %1847 = vmatprep.subr.bf16.mxu1 %v2610_v48 }
  0x34   :  { %1817 = vmatpush1.bf16.msra.mxu0 %v2595_v36 }
  0x35   :  { %1851 = vmatprep.subr.bf16.mxu0 %v2514_v4 }
  0x36   :  { %1849 = vmatpush1.bf16.msra.mxu1 %v2614_v55 }
  0x37   :  { %v2341_v57 = vpop.eup %2340  ;;  %1883 = vmatprep.subr.bf16.mxu1 %v2533_v28 }
  0x38   :  { %v106_v59 = vmul.f32 %v2341_v57, %v104_v52  ;;  %v112_v62 = vrot.slane %v2341_v57, 2 }
  0x3a   :  { %v109_v61 = vadd.f32 %v107_v56, %v106_v59  ;;  %v114_v1 = vsub.f32 1.0, %v112_v62  ;;  %v116_v6 = vmul.f32 0.0, %v112_v62  ;;  %v122_v59 = vcombine.high %v1707_v26, %v1707_v26 }
  0x3c   :  { %2342 = vtanh.f32 %v109_v61  ;;  %v136_v61 = vrot.slane %v122_v59, %v2656_v24 }
  0x3e   :  { %v138_v63 = vcombine.high %v136_v61, %v136_v61 }
  0x46   :  { %v2343_v7 = vpop.eup %2342 }
  0x47   :  { %v115_v11 = vmul.f32 %v2343_v7, %v114_v1 }
  0x49   :  { %v117_v13 = vadd.f32 %v116_v6, %v115_v11 }
  0x4b   :  { %v2620_v42 = vsel %vm95_vm0, %v117_v13, 0.0  ;;  %1708 = vmatmul.mubr.msk.f32.vlgmr.msra.gmra.mrb[0].mxu0 %vm95_vm0, %v117_v13  ;;  %1709 = vmatmul.mubr.msk.f32.vlgmr.msra.gmra.mrb[0].mxu1 %vm95_vm0, %v117_v13 }
  0x4c   :  { %1853 = vmatpush1.bf16.msra.mxu0 %v2516_v8  ;;  %1885 = vmatpush1.bf16.msra.mxu1 %v2535_v33 }
  0x4d   :  { %1855 = vmatprep.subr.bf16.mxu0 %v2518_v9  ;;  %1887 = vmatprep.subr.bf16.mxu1 %v2545_v40 }
  0x4e   :  { %392 = vmatprep.mubr.f32.mxu0 %v2475_v0  ;;  %463 = vmatprep.mubr.f32.mxu1 %v2475_v0 }
  0x50   :  { %1857 = vmatpush1.bf16.msra.mxu0 %v2522_v14  ;;  %1889 = vmatpush1.bf16.msra.mxu1 %v2552_v45 }
  0x51   :  { %1859 = vmatprep.subr.bf16.mxu0 %v2525_v15  ;;  %1891 = vmatprep.subr.bf16.mxu1 %v2556_v49 }
  0x54   :  { %1861 = vmatpush1.bf16.msra.mxu0 %v2528_v20  ;;  %1893 = vmatpush1.bf16.msra.mxu1 %v2565_v58 }
  0x55   :  { %1863 = vmatprep.subr.bf16.mxu0 %v2531_v23  ;;  %1895 = vmatprep.subr.bf16.mxu1 %v2568_v60 }
  0x58   :  { %1865 = vmatpush1.bf16.msra.mxu0 %v2538_v34  ;;  %1897 = vmatpush1.bf16.msra.mxu1 %v2577_v10 }
  0x59   :  { %1867 = vmatprep.subr.bf16.mxu0 %v2542_v39  ;;  %1899 = vmatprep.subr.bf16.mxu1 %v2580_v12 }
  0x5c   :  { %1869 = vmatpush1.bf16.msra.mxu0 %v2559_v53  ;;  %1901 = vmatpush1.bf16.msra.mxu1 %v2589_v25 }
  0x5d   :  { %1871 = vmatprep.subr.bf16.mxu0 %v2562_v54  ;;  %1903 = vmatprep.subr.bf16.mxu1 %v2592_v27 }
  0x60   :  { %1873 = vmatpush1.bf16.msra.mxu0 %v2571_v2  ;;  %1905 = vmatpush1.bf16.msra.mxu1 %v2599_v37 }
  0x61   :  { %1875 = vmatprep.subr.bf16.mxu0 %v2574_v3  ;;  %1907 = vmatprep.subr.bf16.mxu1 %v2602_v38 }
  0x64   :  { %1877 = vmatpush1.bf16.msra.mxu0 %v2583_v19  ;;  %1909 = vmatpush1.bf16.msra.mxu1 %v2606_v47 }
  0x65   :  { %1879 = vmatprep.subr.bf16.mxu0 %v2586_v21  ;;  %1911 = vmatprep.subr.bf16.mxu1 %v2610_v48 }
  0x68   :  { %1881 = vmatpush1.bf16.msra.mxu0 %v2595_v36  ;;  %1913 = vmatpush1.bf16.msra.mxu1 %v2614_v55 }
  0x69   :  { %1915 = vmatprep.subr.bf16.mxu0 %v2514_v4  ;;  %1947 = vmatprep.subr.bf16.mxu1 %v2533_v28 }
 0x11e   :  { %v209_v31 = vpop.f32.mrb[0].mxu0  ;;  %v280_v32 = vpop.f32.mrb[0].mxu1 }
 0x11f   :  { %v210_v35 = vadd.f32 %v209_v31, %v129_v29  ;;  %v211_v41 = vpop.f32.mrb[1].mxu0  ;;  %v282_v43 = vpop.f32.mrb[1].mxu1  ;;  %v281_v62 = vadd.f32 %v280_v32, %v136_v61 }
 0x120   :  { %v212_v44 = vadd.f32 %v211_v41, %v137_v30  ;;  %v283_v7 = vadd.f32 %v282_v43, %v138_v63 }
 0x121   :  { %v1710_v46 = vmul.f32 -1.442695, %v210_v35 }
 0x122   :  { %v1711_v50 = vmul.f32 -1.442695, %v212_v44 }
 0x123   :  { %2344 = vpow2.f32 %v1710_v46 }
 0x124   :  { %2346 = vpow2.f32 %v1711_v50 }
 0x12d   :  { %v2345_v51 = vpop.eup %2344 }
 0x12e   :  { %v2347_v52 = vpop.eup %2346  ;;  %v291_v56 = vadd.f32 1.0, %v2345_v51 }
 0x12f   :  { %v292_v57 = vadd.f32 1.0, %v2347_v52 }
 0x130   :  { %2348 = vrcp.f32 %v291_v56 }
 0x131   :  { %2350 = vrcp.f32 %v292_v57 }
 0x13a   :  { %v2349_v1 = vpop.eup %2348 }
 0x13b   :  { %v2351_v5 = vpop.eup %2350  ;;  %v297_v6 = vmul.f32 %v2349_v1, %v281_v62 }
 0x13c   :  { %v302_v11 = vmul.f32 %v2351_v5, %v2620_v42  ;;  %v300_v16 = vsub.f32 1.0, %v2351_v5  ;;  %v1712_v42 = vld [vmem:[%s3000_s0 + $0x10] sm:$0xff] }
 0x13d   :  { %v298_v13 = vadd.f32 %v297_v6, %v283_v7  ;;  %v314_v26 = vrot.slane %v1712_v42, %v2656_v24  ;;  %v307_v52 = vcombine.high %v1712_v42, %v1712_v42 }
 0x13f   :  { %2352 = vtanh.f32 %v298_v13  ;;  %v322_v31 = vcombine.high %v314_v26, %v314_v26  ;;  %v321_v56 = vrot.slane %v307_v52, %v2656_v24 }
 0x141   :  { %v323_v61 = vcombine.high %v321_v56, %v321_v56 }
 0x149   :  { %v2353_v17 = vpop.eup %2352 }
 0x14a   :  { %v301_v18 = vmul.f32 %v2353_v17, %v300_v16 }
 0x14c   :  { %v2664_v22 = vadd.f32 %v302_v11, %v301_v18 }
 0x14e   :  { %393 = vmatmul.mubr.f32.vlgmr.msra.gmra.mrb[2].mxu0 %v2664_v22  ;;  %464 = vmatmul.mubr.f32.vlgmr.msra.gmra.mrb[2].mxu1 %v2664_v22 }
 0x14f   :  { %1917 = vmatpush1.bf16.msra.mxu0 %v2516_v8  ;;  %1949 = vmatpush1.bf16.msra.mxu1 %v2535_v33 }
 0x150   :  { %1919 = vmatprep.subr.bf16.mxu0 %v2518_v9  ;;  %1951 = vmatprep.subr.bf16.mxu1 %v2545_v40 }
 0x151   :  { %577 = vmatprep.mubr.f32.mxu0 %v2475_v0  ;;  %648 = vmatprep.mubr.f32.mxu1 %v2475_v0 }
 0x153   :  { %1921 = vmatpush1.bf16.msra.mxu0 %v2522_v14  ;;  %1953 = vmatpush1.bf16.msra.mxu1 %v2552_v45 }
 0x154   :  { %1923 = vmatprep.subr.bf16.mxu0 %v2525_v15  ;;  %1955 = vmatprep.subr.bf16.mxu1 %v2556_v49 }
 0x157   :  { %1925 = vmatpush1.bf16.msra.mxu0 %v2528_v20  ;;  %1957 = vmatpush1.bf16.msra.mxu1 %v2565_v58 }
 0x158   :  { %1927 = vmatprep.subr.bf16.mxu0 %v2531_v23  ;;  %1959 = vmatprep.subr.bf16.mxu1 %v2568_v60 }
 0x15b   :  { %1929 = vmatpush1.bf16.msra.mxu0 %v2538_v34  ;;  %1961 = vmatpush1.bf16.msra.mxu1 %v2577_v10 }
 0x15c   :  { %1931 = vmatprep.subr.bf16.mxu0 %v2542_v39  ;;  %1963 = vmatprep.subr.bf16.mxu1 %v2580_v12 }
 0x15f   :  { %1933 = vmatpush1.bf16.msra.mxu0 %v2559_v53  ;;  %1965 = vmatpush1.bf16.msra.mxu1 %v2589_v25 }
 0x160   :  { %1935 = vmatprep.subr.bf16.mxu0 %v2562_v54  ;;  %1967 = vmatprep.subr.bf16.mxu1 %v2592_v27 }
 0x163   :  { %1937 = vmatpush1.bf16.msra.mxu0 %v2571_v2  ;;  %1969 = vmatpush1.bf16.msra.mxu1 %v2599_v37 }
 0x164   :  { %1939 = vmatprep.subr.bf16.mxu0 %v2574_v3  ;;  %1971 = vmatprep.subr.bf16.mxu1 %v2602_v38 }
 0x167   :  { %1941 = vmatpush1.bf16.msra.mxu0 %v2583_v19  ;;  %1973 = vmatpush1.bf16.msra.mxu1 %v2606_v47 }
 0x168   :  { %1943 = vmatprep.subr.bf16.mxu0 %v2586_v21  ;;  %1975 = vmatprep.subr.bf16.mxu1 %v2610_v48 }
 0x16b   :  { %1945 = vmatpush1.bf16.msra.mxu0 %v2595_v36  ;;  %1977 = vmatpush1.bf16.msra.mxu1 %v2614_v55 }
 0x16c   :  { %1979 = vmatprep.subr.bf16.mxu0 %v2514_v4  ;;  %2011 = vmatprep.subr.bf16.mxu1 %v2533_v28 }
 0x221   :  { %v394_v29 = vpop.f32.mrb[2].mxu0  ;;  %v465_v30 = vpop.f32.mrb[2].mxu1 }
 0x222   :  { %v395_v32 = vadd.f32 %v394_v29, %v314_v26  ;;  %v396_v35 = vpop.f32.mrb[3].mxu0  ;;  %v467_v41 = vpop.f32.mrb[3].mxu1  ;;  %v466_v62 = vadd.f32 %v465_v30, %v321_v56 }
 0x223   :  { %v397_v44 = vadd.f32 %v396_v35, %v322_v31  ;;  %v468_v5 = vadd.f32 %v467_v41, %v323_v61 }
 0x224   :  { %v1713_v43 = vmul.f32 -1.442695, %v395_v32 }
 0x225   :  { %v1714_v46 = vmul.f32 -1.442695, %v397_v44 }
 0x226   :  { %2354 = vpow2.f32 %v1713_v43 }
 0x227   :  { %2356 = vpow2.f32 %v1714_v46 }
 0x230   :  { %v2355_v50 = vpop.eup %2354 }
 0x231   :  { %v476_v51 = vadd.f32 1.0, %v2355_v50  ;;  %v2357_v57 = vpop.eup %2356 }
 0x232   :  { %v477_v59 = vadd.f32 1.0, %v2357_v57 }
 0x233   :  { %2358 = vrcp.f32 %v476_v51 }
 0x234   :  { %2360 = vrcp.f32 %v477_v59 }
 0x23d   :  { %v2359_v63 = vpop.eup %2358 }
 0x23e   :  { %v482_v1 = vmul.f32 %v2359_v63, %v466_v62  ;;  %v2361_v7 = vpop.eup %2360 }
 0x23f   :  { %v485_v11 = vsub.f32 1.0, %v2361_v7  ;;  %v487_v17 = vmul.f32 %v2361_v7, %v2664_v22  ;;  %v1715_v22 = vld [vmem:[%s3000_s0 + $0x18] sm:$0xff] }
 0x240   :  { %v483_v6 = vadd.f32 %v482_v1, %v468_v5  ;;  %v499_v42 = vrot.slane %v1715_v22, %v2656_v24  ;;  %v492_v51 = vcombine.high %v1715_v22, %v1715_v22 }
 0x242   :  { %2362 = vtanh.f32 %v483_v6  ;;  %v507_v30 = vcombine.high %v499_v42, %v499_v42  ;;  %v506_v52 = vrot.slane %v492_v51, %v2656_v24 }
 0x244   :  { %v508_v59 = vcombine.high %v506_v52, %v506_v52 }
 0x24c   :  { %v2363_v13 = vpop.eup %2362 }
 0x24d   :  { %v486_v16 = vmul.f32 %v2363_v13, %v485_v11 }
 0x24f   :  { %v2708_v18 = vadd.f32 %v487_v17, %v486_v16 }
 0x251   :  { %578 = vmatmul.mubr.f32.vlgmr.msra.gmra.mrb[4].mxu0 %v2708_v18  ;;  %649 = vmatmul.mubr.f32.vlgmr.msra.gmra.mrb[4].mxu1 %v2708_v18 }
 0x252   :  { %1981 = vmatpush1.bf16.msra.mxu0 %v2516_v8  ;;  %2013 = vmatpush1.bf16.msra.mxu1 %v2535_v33 }
 0x253   :  { %1983 = vmatprep.subr.bf16.mxu0 %v2518_v9  ;;  %2015 = vmatprep.subr.bf16.mxu1 %v2545_v40 }
 0x254   :  { %762 = vmatprep.mubr.f32.mxu0 %v2475_v0  ;;  %833 = vmatprep.mubr.f32.mxu1 %v2475_v0 }
 0x256   :  { %1985 = vmatpush1.bf16.msra.mxu0 %v2522_v14  ;;  %2017 = vmatpush1.bf16.msra.mxu1 %v2552_v45 }
 0x257   :  { %1987 = vmatprep.subr.bf16.mxu0 %v2525_v15  ;;  %2019 = vmatprep.subr.bf16.mxu1 %v2556_v49 }
 0x25a   :  { %1989 = vmatpush1.bf16.msra.mxu0 %v2528_v20  ;;  %2021 = vmatpush1.bf16.msra.mxu1 %v2565_v58 }
 0x25b   :  { %1991 = vmatprep.subr.bf16.mxu0 %v2531_v23  ;;  %2023 = vmatprep.subr.bf16.mxu1 %v2568_v60 }
 0x25e   :  { %1993 = vmatpush1.bf16.msra.mxu0 %v2538_v34  ;;  %2025 = vmatpush1.bf16.msra.mxu1 %v2577_v10 }
 0x25f   :  { %1995 = vmatprep.subr.bf16.mxu0 %v2542_v39  ;;  %2027 = vmatprep.subr.bf16.mxu1 %v2580_v12 }
 0x262   :  { %1997 = vmatpush1.bf16.msra.mxu0 %v2559_v53  ;;  %2029 = vmatpush1.bf16.msra.mxu1 %v2589_v25 }
 0x263   :  { %1999 = vmatprep.subr.bf16.mxu0 %v2562_v54  ;;  %2031 = vmatprep.subr.bf16.mxu1 %v2592_v27 }
 0x266   :  { %2001 = vmatpush1.bf16.msra.mxu0 %v2571_v2  ;;  %2033 = vmatpush1.bf16.msra.mxu1 %v2599_v37 }
 0x267   :  { %2003 = vmatprep.subr.bf16.mxu0 %v2574_v3  ;;  %2035 = vmatprep.subr.bf16.mxu1 %v2602_v38 }
 0x26a   :  { %2005 = vmatpush1.bf16.msra.mxu0 %v2583_v19  ;;  %2037 = vmatpush1.bf16.msra.mxu1 %v2606_v47 }
 0x26b   :  { %2007 = vmatprep.subr.bf16.mxu0 %v2586_v21  ;;  %2039 = vmatprep.subr.bf16.mxu1 %v2610_v48 }
 0x26e   :  { %2009 = vmatpush1.bf16.msra.mxu0 %v2595_v36  ;;  %2041 = vmatpush1.bf16.msra.mxu1 %v2614_v55 }
 0x26f   :  { %2043 = vmatprep.subr.bf16.mxu0 %v2514_v4  ;;  %2075 = vmatprep.subr.bf16.mxu1 %v2533_v28 }
 0x324   :  { %v579_v26 = vpop.f32.mrb[4].mxu0  ;;  %v650_v29 = vpop.f32.mrb[4].mxu1 }
 0x325   :  { %v580_v31 = vadd.f32 %v579_v26, %v499_v42  ;;  %v581_v32 = vpop.f32.mrb[5].mxu0  ;;  %v652_v35 = vpop.f32.mrb[5].mxu1  ;;  %v651_v61 = vadd.f32 %v650_v29, %v506_v52 }
 0x326   :  { %v582_v43 = vadd.f32 %v581_v32, %v507_v30  ;;  %v653_v1 = vadd.f32 %v652_v35, %v508_v59 }
 0x327   :  { %v1716_v41 = vmul.f32 -1.442695, %v580_v31 }
 0x328   :  { %v1717_v44 = vmul.f32 -1.442695, %v582_v43 }
 0x329   :  { %2364 = vpow2.f32 %v1716_v41 }
 0x32a   :  { %2366 = vpow2.f32 %v1717_v44 }
 0x333   :  { %v2365_v46 = vpop.eup %2364 }
 0x334   :  { %v661_v50 = vadd.f32 1.0, %v2365_v46  ;;  %v2367_v56 = vpop.eup %2366 }
 0x335   :  { %v662_v57 = vadd.f32 1.0, %v2367_v56 }
 0x336   :  { %2368 = vrcp.f32 %v661_v50 }
 0x337   :  { %2370 = vrcp.f32 %v662_v57 }
 0x340   :  { %v2369_v62 = vpop.eup %2368 }
 0x341   :  { %v667_v63 = vmul.f32 %v2369_v62, %v651_v61  ;;  %v2371_v6 = vpop.eup %2370 }
 0x342   :  { %v670_v7 = vsub.f32 1.0, %v2371_v6  ;;  %v672_v16 = vmul.f32 %v2371_v6, %v2708_v18  ;;  %v1718_v18 = vld [vmem:[%s3000_s0 + $0x20] sm:$0xff] }
 0x343   :  { %v668_v5 = vadd.f32 %v667_v63, %v653_v1  ;;  %v684_v22 = vrot.slane %v1718_v18, %v2656_v24  ;;  %v677_v50 = vcombine.high %v1718_v18, %v1718_v18 }
 0x345   :  { %2372 = vtanh.f32 %v668_v5  ;;  %v692_v29 = vcombine.high %v684_v22, %v684_v22  ;;  %v691_v51 = vrot.slane %v677_v50, %v2656_v24 }
 0x347   :  { %v693_v57 = vcombine.high %v691_v51, %v691_v51 }
 0x34f   :  { %v2373_v11 = vpop.eup %2372 }
 0x350   :  { %v671_v13 = vmul.f32 %v2373_v11, %v670_v7 }
 0x352   :  { %v2752_v17 = vadd.f32 %v672_v16, %v671_v13 }
 0x354   :  { %763 = vmatmul.mubr.f32.vlgmr.msra.gmra.mrb[6].mxu0 %v2752_v17  ;;  %834 = vmatmul.mubr.f32.vlgmr.msra.gmra.mrb[6].mxu1 %v2752_v17 }
 0x355   :  { %2045 = vmatpush1.bf16.msra.mxu0 %v2516_v8  ;;  %2077 = vmatpush1.bf16.msra.mxu1 %v2535_v33 }
 0x356   :  { %2047 = vmatprep.subr.bf16.mxu0 %v2518_v9  ;;  %2079 = vmatprep.subr.bf16.mxu1 %v2545_v40 }
 0x357   :  { %947 = vmatprep.mubr.f32.mxu0 %v2475_v0  ;;  %1018 = vmatprep.mubr.f32.mxu1 %v2475_v0 }
 0x359   :  { %2049 = vmatpush1.bf16.msra.mxu0 %v2522_v14  ;;  %2081 = vmatpush1.bf16.msra.mxu1 %v2552_v45 }
 0x35a   :  { %2051 = vmatprep.subr.bf16.mxu0 %v2525_v15  ;;  %2083 = vmatprep.subr.bf16.mxu1 %v2556_v49 }
 0x35d   :  { %2053 = vmatpush1.bf16.msra.mxu0 %v2528_v20  ;;  %2085 = vmatpush1.bf16.msra.mxu1 %v2565_v58 }
 0x35e   :  { %2055 = vmatprep.subr.bf16.mxu0 %v2531_v23  ;;  %2087 = vmatprep.subr.bf16.mxu1 %v2568_v60 }
 0x361   :  { %2057 = vmatpush1.bf16.msra.mxu0 %v2538_v34  ;;  %2089 = vmatpush1.bf16.msra.mxu1 %v2577_v10 }
 0x362   :  { %2059 = vmatprep.subr.bf16.mxu0 %v2542_v39  ;;  %2091 = vmatprep.subr.bf16.mxu1 %v2580_v12 }
 0x365   :  { %2061 = vmatpush1.bf16.msra.mxu0 %v2559_v53  ;;  %2093 = vmatpush1.bf16.msra.mxu1 %v2589_v25 }
 0x366   :  { %2063 = vmatprep.subr.bf16.mxu0 %v2562_v54  ;;  %2095 = vmatprep.subr.bf16.mxu1 %v2592_v27 }
 0x369   :  { %2065 = vmatpush1.bf16.msra.mxu0 %v2571_v2  ;;  %2097 = vmatpush1.bf16.msra.mxu1 %v2599_v37 }
 0x36a   :  { %2067 = vmatprep.subr.bf16.mxu0 %v2574_v3  ;;  %2099 = vmatprep.subr.bf16.mxu1 %v2602_v38 }
 0x36d   :  { %2069 = vmatpush1.bf16.msra.mxu0 %v2583_v19  ;;  %2101 = vmatpush1.bf16.msra.mxu1 %v2606_v47 }
 0x36e   :  { %2071 = vmatprep.subr.bf16.mxu0 %v2586_v21  ;;  %2103 = vmatprep.subr.bf16.mxu1 %v2610_v48 }
 0x371   :  { %2073 = vmatpush1.bf16.msra.mxu0 %v2595_v36  ;;  %2105 = vmatpush1.bf16.msra.mxu1 %v2614_v55 }
 0x372   :  { %2107 = vmatprep.subr.bf16.mxu0 %v2514_v4  ;;  %2139 = vmatprep.subr.bf16.mxu1 %v2533_v28 }
 0x427   :  { %v764_v42 = vpop.f32.mrb[6].mxu0  ;;  %v835_v26 = vpop.f32.mrb[6].mxu1 }
 0x428   :  { %v765_v30 = vadd.f32 %v764_v42, %v684_v22  ;;  %v766_v31 = vpop.f32.mrb[7].mxu0  ;;  %v837_v32 = vpop.f32.mrb[7].mxu1  ;;  %v836_v59 = vadd.f32 %v835_v26, %v691_v51 }
 0x429   :  { %v767_v41 = vadd.f32 %v766_v31, %v692_v29  ;;  %v838_v63 = vadd.f32 %v837_v32, %v693_v57 }
 0x42a   :  { %v1719_v35 = vmul.f32 -1.442695, %v765_v30 }
 0x42b   :  { %v1720_v43 = vmul.f32 -1.442695, %v767_v41 }
 0x42c   :  { %2374 = vpow2.f32 %v1719_v35 }
 0x42d   :  { %2376 = vpow2.f32 %v1720_v43 }
 0x436   :  { %v2375_v44 = vpop.eup %2374 }
 0x437   :  { %v846_v46 = vadd.f32 1.0, %v2375_v44  ;;  %v2377_v52 = vpop.eup %2376 }
 0x438   :  { %v847_v56 = vadd.f32 1.0, %v2377_v52 }
 0x439   :  { %2378 = vrcp.f32 %v846_v46 }
 0x43a   :  { %2380 = vrcp.f32 %v847_v56 }
 0x443   :  { %v2379_v61 = vpop.eup %2378 }
 0x444   :  { %v852_v62 = vmul.f32 %v2379_v61, %v836_v59  ;;  %v2381_v5 = vpop.eup %2380 }
 0x445   :  { %v855_v6 = vsub.f32 1.0, %v2381_v5  ;;  %v857_v13 = vmul.f32 %v2381_v5, %v2752_v17  ;;  %v1721_v17 = vld [vmem:[%s3000_s0 + $0x28] sm:$0xff] }
 0x446   :  { %v853_v1 = vadd.f32 %v852_v62, %v838_v63  ;;  %v869_v18 = vrot.slane %v1721_v17, %v2656_v24  ;;  %v862_v46 = vcombine.high %v1721_v17, %v1721_v17 }
 0x448   :  { %2382 = vtanh.f32 %v853_v1  ;;  %v877_v26 = vcombine.high %v869_v18, %v869_v18  ;;  %v876_v50 = vrot.slane %v862_v46, %v2656_v24 }
 0x44a   :  { %v878_v56 = vcombine.high %v876_v50, %v876_v50 }
 0x452   :  { %v2383_v7 = vpop.eup %2382 }
 0x453   :  { %v856_v11 = vmul.f32 %v2383_v7, %v855_v6 }
 0x455   :  { %v2796_v16 = vadd.f32 %v857_v13, %v856_v11 }
 0x457   :  { %948 = vmatmul.mubr.f32.vlgmr.msra.gmra.mrb[8].mxu0 %v2796_v16  ;;  %1019 = vmatmul.mubr.f32.vlgmr.msra.gmra.mrb[8].mxu1 %v2796_v16 }
 0x458   :  { %2109 = vmatpush1.bf16.msra.mxu0 %v2516_v8  ;;  %2141 = vmatpush1.bf16.msra.mxu1 %v2535_v33 }
 0x459   :  { %2111 = vmatprep.subr.bf16.mxu0 %v2518_v9  ;;  %2143 = vmatprep.subr.bf16.mxu1 %v2545_v40 }
 0x45a   :  { %1132 = vmatprep.mubr.f32.mxu0 %v2475_v0  ;;  %1203 = vmatprep.mubr.f32.mxu1 %v2475_v0 }
 0x45c   :  { %2113 = vmatpush1.bf16.msra.mxu0 %v2522_v14  ;;  %2145 = vmatpush1.bf16.msra.mxu1 %v2552_v45 }
 0x45d   :  { %2115 = vmatprep.subr.bf16.mxu0 %v2525_v15  ;;  %2147 = vmatprep.subr.bf16.mxu1 %v2556_v49 }
 0x460   :  { %2117 = vmatpush1.bf16.msra.mxu0 %v2528_v20  ;;  %2149 = vmatpush1.bf16.msra.mxu1 %v2565_v58 }
 0x461   :  { %2119 = vmatprep.subr.bf16.mxu0 %v2531_v23  ;;  %2151 = vmatprep.subr.bf16.mxu1 %v2568_v60 }
 0x464   :  { %2121 = vmatpush1.bf16.msra.mxu0 %v2538_v34  ;;  %2153 = vmatpush1.bf16.msra.mxu1 %v2577_v10 }
 0x465   :  { %2123 = vmatprep.subr.bf16.mxu0 %v2542_v39  ;;  %2155 = vmatprep.subr.bf16.mxu1 %v2580_v12 }
 0x468   :  { %2125 = vmatpush1.bf16.msra.mxu0 %v2559_v53  ;;  %2157 = vmatpush1.bf16.msra.mxu1 %v2589_v25 }
 0x469   :  { %2127 = vmatprep.subr.bf16.mxu0 %v2562_v54  ;;  %2159 = vmatprep.subr.bf16.mxu1 %v2592_v27 }
 0x46c   :  { %2129 = vmatpush1.bf16.msra.mxu0 %v2571_v2  ;;  %2161 = vmatpush1.bf16.msra.mxu1 %v2599_v37 }
 0x46d   :  { %2131 = vmatprep.subr.bf16.mxu0 %v2574_v3  ;;  %2163 = vmatprep.subr.bf16.mxu1 %v2602_v38 }
 0x470   :  { %2133 = vmatpush1.bf16.msra.mxu0 %v2583_v19  ;;  %2165 = vmatpush1.bf16.msra.mxu1 %v2606_v47 }
 0x471   :  { %2135 = vmatprep.subr.bf16.mxu0 %v2586_v21  ;;  %2167 = vmatprep.subr.bf16.mxu1 %v2610_v48 }
 0x474   :  { %2137 = vmatpush1.bf16.msra.mxu0 %v2595_v36  ;;  %2169 = vmatpush1.bf16.msra.mxu1 %v2614_v55 }
 0x475   :  { %2171 = vmatprep.subr.bf16.mxu0 %v2514_v4  ;;  %2203 = vmatprep.subr.bf16.mxu1 %v2533_v28 }
 0x52a   :  { %v949_v22 = vpop.f32.mrb[8].mxu0  ;;  %v1020_v42 = vpop.f32.mrb[8].mxu1 }
 0x52b   :  { %v950_v29 = vadd.f32 %v949_v22, %v869_v18  ;;  %v951_v30 = vpop.f32.mrb[9].mxu0  ;;  %v1022_v31 = vpop.f32.mrb[9].mxu1  ;;  %v1021_v57 = vadd.f32 %v1020_v42, %v876_v50 }
 0x52c   :  { %v952_v35 = vadd.f32 %v951_v30, %v877_v26  ;;  %v1023_v62 = vadd.f32 %v1022_v31, %v878_v56 }
 0x52d   :  { %v1722_v32 = vmul.f32 -1.442695, %v950_v29 }
 0x52e   :  { %v1723_v41 = vmul.f32 -1.442695, %v952_v35 }
 0x52f   :  { %2384 = vpow2.f32 %v1722_v32 }
 0x530   :  { %2386 = vpow2.f32 %v1723_v41 }
 0x539   :  { %v2385_v43 = vpop.eup %2384 }
 0x53a   :  { %v1031_v44 = vadd.f32 1.0, %v2385_v43  ;;  %v2387_v51 = vpop.eup %2386 }
 0x53b   :  { %v1032_v52 = vadd.f32 1.0, %v2387_v51 }
 0x53c   :  { %2388 = vrcp.f32 %v1031_v44 }
 0x53d   :  { %2390 = vrcp.f32 %v1032_v52 }
 0x546   :  { %v2389_v59 = vpop.eup %2388 }
 0x547   :  { %v1037_v61 = vmul.f32 %v2389_v59, %v1021_v57  ;;  %v2391_v1 = vpop.eup %2390 }
 0x548   :  { %v1040_v5 = vsub.f32 1.0, %v2391_v1  ;;  %v1042_v11 = vmul.f32 %v2391_v1, %v2796_v16  ;;  %v1724_v16 = vld [vmem:[%s3000_s0 + $0x30] sm:$0xff] }
 0x549   :  { %v1038_v63 = vadd.f32 %v1037_v61, %v1023_v62  ;;  %v1054_v17 = vrot.slane %v1724_v16, %v2656_v24 }
 0x54b   :  { %2392 = vtanh.f32 %v1038_v63  ;;  %v1062_v42 = vcombine.high %v1054_v17, %v1054_v17 }
 0x555   :  { %v2393_v6 = vpop.eup %2392 }
 0x556   :  { %v1041_v7 = vmul.f32 %v2393_v6, %v1040_v5 }
 0x558   :  { %v2840_v13 = vadd.f32 %v1042_v11, %v1041_v7  ;;  %v1600_v7 = vld [vmem:[%s3002_s2 + $0x8] sm:$0xff] }
 0x55a   :  { %1133 = vmatmul.mubr.f32.vlgmr.msra.gmra.mrb[10].mxu0 %v2840_v13  ;;  %1204 = vmatmul.mubr.f32.vlgmr.msra.gmra.mrb[10].mxu1 %v2840_v13 }
 0x55b   :  { %2173 = vmatpush1.bf16.msra.mxu0 %v2516_v8  ;;  %2205 = vmatpush1.bf16.msra.mxu1 %v2535_v33 }
 0x55c   :  { %2175 = vmatprep.subr.bf16.mxu0 %v2518_v9  ;;  %2207 = vmatprep.subr.bf16.mxu1 %v2545_v40 }
 0x55d   :  { %1317 = vmatprep.mubr.f32.mxu0 %v2475_v0  ;;  %1388 = vmatprep.mubr.f32.mxu1 %v2475_v0 }
 0x55f   :  { %2177 = vmatpush1.bf16.msra.mxu0 %v2522_v14  ;;  %2209 = vmatpush1.bf16.msra.mxu1 %v2552_v45 }
 0x560   :  { %2179 = vmatprep.subr.bf16.mxu0 %v2525_v15  ;;  %2211 = vmatprep.subr.bf16.mxu1 %v2556_v49 }
 0x563   :  { %2181 = vmatpush1.bf16.msra.mxu0 %v2528_v20  ;;  %2213 = vmatpush1.bf16.msra.mxu1 %v2565_v58 }
 0x564   :  { %2183 = vmatprep.subr.bf16.mxu0 %v2531_v23  ;;  %2215 = vmatprep.subr.bf16.mxu1 %v2568_v60 }
 0x567   :  { %2185 = vmatpush1.bf16.msra.mxu0 %v2538_v34  ;;  %2217 = vmatpush1.bf16.msra.mxu1 %v2577_v10 }
 0x568   :  { %2187 = vmatprep.subr.bf16.mxu0 %v2542_v39  ;;  %2219 = vmatprep.subr.bf16.mxu1 %v2580_v12 }
 0x56b   :  { %2189 = vmatpush1.bf16.msra.mxu0 %v2559_v53  ;;  %2221 = vmatpush1.bf16.msra.mxu1 %v2589_v25 }
 0x56c   :  { %2191 = vmatprep.subr.bf16.mxu0 %v2562_v54  ;;  %2223 = vmatprep.subr.bf16.mxu1 %v2592_v27 }
 0x56f   :  { %2193 = vmatpush1.bf16.msra.mxu0 %v2571_v2  ;;  %2225 = vmatpush1.bf16.msra.mxu1 %v2599_v37 }
 0x570   :  { %2195 = vmatprep.subr.bf16.mxu0 %v2574_v3  ;;  %2227 = vmatprep.subr.bf16.mxu1 %v2602_v38 }
 0x573   :  { %2197 = vmatpush1.bf16.msra.mxu0 %v2583_v19  ;;  %2229 = vmatpush1.bf16.msra.mxu1 %v2606_v47 }
 0x574   :  { %2199 = vmatprep.subr.bf16.mxu0 %v2586_v21  ;;  %2231 = vmatprep.subr.bf16.mxu1 %v2610_v48 }
 0x577   :  { %2201 = vmatpush1.bf16.msra.mxu0 %v2595_v36  ;;  %2233 = vmatpush1.bf16.msra.mxu1 %v2614_v55 }
 0x578   :  { %2235 = vmatprep.subr.bf16.mxu0 %v2514_v4  ;;  %2267 = vmatprep.subr.bf16.mxu1 %v2533_v28  ;;  %v1047_v28 = vcombine.high %v1724_v16, %v1724_v16  ;;  %v1601_v16 = vld [vmem:[%s3002_s2 + $0x10] sm:$0xff] }
 0x57a   :  { %v1061_v43 = vrot.slane %v1047_v28, %v2656_v24  ;;  %v1610_v28 = vld [vmem:[%s3002_s2 + $0x58] sm:$0xff] }
 0x57c   :  { %v1063_v50 = vcombine.high %v1061_v43, %v1061_v43 }
 0x62d   :  { %v1134_v18 = vpop.f32.mrb[10].mxu0  ;;  %v1205_v22 = vpop.f32.mrb[10].mxu1 }
 0x62e   :  { %v1135_v26 = vadd.f32 %v1134_v18, %v1054_v17  ;;  %v1136_v29 = vpop.f32.mrb[11].mxu0  ;;  %v1207_v30 = vpop.f32.mrb[11].mxu1  ;;  %v1206_v51 = vadd.f32 %v1205_v22, %v1061_v43  ;;  %v1602_v17 = vld [vmem:[%s3002_s2 + $0x18] sm:$0xff]  ;;  %v1603_v22 = vld [vmem:[%s3002_s2 + $0x20] sm:$0xff] }
 0x62f   :  { %v1137_v32 = vadd.f32 %v1136_v29, %v1062_v42  ;;  %v1208_v57 = vadd.f32 %v1207_v30, %v1063_v50  ;;  %v2302_v18 = vpack.c.bf16 %v1602_v17, %v1601_v16  ;;  %v1604_v42 = vld [vmem:[%s3002_s2 + $0x28] sm:$0xff]  ;;  %v1605_v29 = vld [vmem:[%s3002_s2 + $0x30] sm:$0xff]  ;;  %v1606_v30 = vld [vmem:[%s3002_s2 + $0x38] sm:$0xff] }
 0x630   :  { %v1725_v31 = vmul.f32 -1.442695, %v1135_v26  ;;  %v2305_v26 = vpack.c.bf16 %v1604_v42, %v1603_v22 }
 0x631   :  { %v1726_v35 = vmul.f32 -1.442695, %v1137_v32  ;;  %v1607_v32 = vld [vmem:[%s3002_s2 + $0x40] sm:$0xff] }
 0x632   :  { %2394 = vpow2.f32 %v1725_v31  ;;  %v2308_v31 = vpack.c.bf16 %v1606_v30, %v1605_v29 }
 0x633   :  { %2396 = vpow2.f32 %v1726_v35  ;;  %v1608_v35 = vld [vmem:[%s3002_s2 + $0x48] sm:$0xff] }
 0x63c   :  { %v2395_v4 = vpop.eup %2394 }
 0x63d   :  { %v1216_v41 = vadd.f32 1.0, %v2395_v4  ;;  %v2397_v44 = vpop.eup %2396  ;;  %v2311_v4 = vpack.c.bf16 %v1608_v35, %v1607_v32 }
 0x63e   :  { %v1217_v46 = vadd.f32 1.0, %v2397_v44  ;;  %v1611_v44 = vld [vmem:[%s3002_s2 + $0x60] sm:$0xff] }
 0x63f   :  { %2398 = vrcp.f32 %v1216_v41  ;;  %v1609_v41 = vld [vmem:[%s3002_s2 + $0x50] sm:$0xff] }
 0x640   :  { %2400 = vrcp.f32 %v1217_v46  ;;  %v2314_v43 = vpack.c.bf16 %v1610_v28, %v1609_v41  ;;  %v1612_v46 = vld [vmem:[%s3002_s2 + $0x68] sm:$0xff] }
 0x641   :  { %v2317_v50 = vpack.c.bf16 %v1612_v46, %v1611_v44 }
 0x649   :  { %v2399_v52 = vpop.eup %2398 }
 0x64a   :  { %v1222_v56 = vmul.f32 %v2399_v52, %v1206_v51  ;;  %v2401_v61 = vpop.eup %2400  ;;  %v1613_v51 = vld [vmem:[%s3002_s2 + $0x70] sm:$0xff]  ;;  %v1614_v52 = vld [vmem:[%s3002_s2 + $0x78] sm:$0xff] }
 0x64b   :  { %v1225_v62 = vsub.f32 1.0, %v2401_v61  ;;  %v1227_v5 = vmul.f32 %v2401_v61, %v2840_v13  ;;  %v2477_v13 = vmov 0.0|0.0  }
 0x64c   :  { %v1223_v59 = vadd.f32 %v1222_v56, %v1208_v57  ;;  %v2320_v56 = vpack.c.bf16 %v1614_v52, %v1613_v51  ;;  %v1730_v57 = vld [vmem:[%s3000_s0 + $0x40] sm:$0xff] }
 0x64e   :  { %2402 = vtanh.f32 %v1223_v59 }
 0x658   :  { %v2403_v63 = vpop.eup %2402 }
 0x659   :  { %v1226_v1 = vmul.f32 %v2403_v63, %v1225_v62 }
 0x65b   :  { %v2884_v6 = vadd.f32 %v1227_v5, %v1226_v1 }
 0x65d   :  { %1318 = vmatmul.mubr.f32.vlgmr.msra.gmra.mrb[12].mxu0 %v2884_v6  ;;  %1389 = vmatmul.mubr.f32.vlgmr.msra.gmra.mrb[12].mxu1 %v2884_v6 }
 0x65e   :  { %2237 = vmatpush1.bf16.msra.mxu0 %v2516_v8  ;;  %2269 = vmatpush1.bf16.msra.mxu1 %v2535_v33  ;;  %v1727_v8 = vld [vmem:[%s3000_s0 + $0x38] sm:$0xff] }
 0x65f   :  { %2239 = vmatprep.subr.bf16.mxu0 %v2518_v9  ;;  %2271 = vmatprep.subr.bf16.mxu1 %v2545_v40  ;;  %v1239_v9 = vrot.slane %v1727_v8, %v2656_v24 }
 0x660   :  { %1502 = vmatprep.mubr.f32.mxu0 %v2475_v0  ;;  %1573 = vmatprep.mubr.f32.mxu1 %v2475_v0 }
 0x662   :  { %2241 = vmatpush1.bf16.msra.mxu0 %v2522_v14  ;;  %2273 = vmatpush1.bf16.msra.mxu1 %v2552_v45 }
 0x663   :  { %2243 = vmatprep.subr.bf16.mxu0 %v2525_v15  ;;  %2275 = vmatprep.subr.bf16.mxu1 %v2556_v49 }
 0x666   :  { %2245 = vmatpush1.bf16.msra.mxu0 %v2528_v20  ;;  %2277 = vmatpush1.bf16.msra.mxu1 %v2565_v58  ;;  %v1247_v20 = vcombine.high %v1239_v9, %v1239_v9 }
 0x667   :  { %2247 = vmatprep.subr.bf16.mxu0 %v2531_v23  ;;  %2279 = vmatprep.subr.bf16.mxu1 %v2568_v60 }
 0x66a   :  { %2249 = vmatpush1.bf16.msra.mxu0 %v2538_v34  ;;  %2281 = vmatpush1.bf16.msra.mxu1 %v2577_v10 }
 0x66b   :  { %2251 = vmatprep.subr.bf16.mxu0 %v2542_v39  ;;  %2283 = vmatprep.subr.bf16.mxu1 %v2580_v12 }
 0x66e   :  { %2253 = vmatpush1.bf16.msra.mxu0 %v2559_v53  ;;  %2285 = vmatpush1.bf16.msra.mxu1 %v2589_v25 }
 0x66f   :  { %2255 = vmatprep.subr.bf16.mxu0 %v2562_v54  ;;  %2287 = vmatprep.subr.bf16.mxu1 %v2592_v27  ;;  %v1232_v54 = vcombine.high %v1727_v8, %v1727_v8 }
 0x671   :  { %v1246_v58 = vrot.slane %v1232_v54, %v2656_v24 }
 0x672   :  { %2257 = vmatpush1.bf16.msra.mxu0 %v2571_v2  ;;  %2289 = vmatpush1.bf16.msra.mxu1 %v2599_v37 }
 0x673   :  { %2259 = vmatprep.subr.bf16.mxu0 %v2574_v3  ;;  %2291 = vmatprep.subr.bf16.mxu1 %v2602_v38  ;;  %v1248_v3 = vcombine.high %v1246_v58, %v1246_v58 }
 0x676   :  { %2261 = vmatpush1.bf16.msra.mxu0 %v2583_v19  ;;  %2293 = vmatpush1.bf16.msra.mxu1 %v2606_v47 }
 0x677   :  { %2263 = vmatprep.subr.bf16.mxu0 %v2586_v21  ;;  %2295 = vmatprep.subr.bf16.mxu1 %v2610_v48 }
 0x67a   :  { %2265 = vmatpush1.bf16.msra.mxu0 %v2595_v36  ;;  %2297 = vmatpush1.bf16.msra.mxu1 %v2614_v55  ;;  %v1599_v55 = vld [vmem:[%s3002_s2] sm:$0xff] }
 0x67b   :  { %v2299_v11 = vpack.c.bf16 %v1600_v7, %v1599_v55  ;;  %2298 = vmatprep.subr.bf16.mxu0 %v2477_v13 }
 0x730   :  { %v1319_v14 = vpop.f32.mrb[12].mxu0  ;;  %v1390_v15 = vpop.f32.mrb[12].mxu1 }
 0x731   :  { %v1320_v23 = vadd.f32 %v1319_v14, %v1239_v9  ;;  %v1321_v33 = vpop.f32.mrb[13].mxu0  ;;  %v1392_v34 = vpop.f32.mrb[13].mxu1  ;;  %v1391_v10 = vadd.f32 %v1390_v15, %v1246_v58 }
 0x732   :  { %v1322_v40 = vadd.f32 %v1321_v33, %v1247_v20  ;;  %v1393_v21 = vadd.f32 %v1392_v34, %v1248_v3  ;;  %v1417_v20 = vcombine.high %v1730_v57, %v1730_v57 }
 0x733   :  { %v1728_v39 = vmul.f32 -1.442695, %v1320_v23 }
 0x734   :  { %v1729_v45 = vmul.f32 -1.442695, %v1322_v40  ;;  %v1431_v23 = vrot.slane %v1417_v20, %v2656_v24 }
 0x735   :  { %2404 = vpow2.f32 %v1728_v39 }
 0x736   :  { %2406 = vpow2.f32 %v1729_v45  ;;  %v1433_v39 = vcombine.high %v1431_v23, %v1431_v23 }
 0x73f   :  { %v2405_v49 = vpop.eup %2404 }
 0x740   :  { %v1401_v53 = vadd.f32 1.0, %v2405_v49  ;;  %v2407_v60 = vpop.eup %2406 }
 0x741   :  { %v1402_v2 = vadd.f32 1.0, %v2407_v60 }
 0x742   :  { %2408 = vrcp.f32 %v1401_v53 }
 0x743   :  { %2410 = vrcp.f32 %v1402_v2 }
 0x74c   :  { %v2409_v12 = vpop.eup %2408 }
 0x74d   :  { %v1407_v19 = vmul.f32 %v2409_v12, %v1391_v10  ;;  %v2411_v27 = vpop.eup %2410 }
 0x74e   :  { %v1410_v36 = vsub.f32 1.0, %v2411_v27  ;;  %v1412_v47 = vmul.f32 %v2411_v27, %v2884_v6 }
 0x74f   :  { %v1408_v25 = vadd.f32 %v1407_v19, %v1393_v21 }
 0x751   :  { %2412 = vtanh.f32 %v1408_v25 }
 0x75b   :  { %v2413_v37 = vpop.eup %2412 }
 0x75c   :  { %v1411_v38 = vmul.f32 %v2413_v37, %v1410_v36 }
 0x75e   :  { %v2926_v48 = vadd.f32 %v1412_v47, %v1411_v38 }
 0x760   :  { %1503 = vmatmul.mubr.f32.vlgmr.msra.gmra.mrb[14].mxu0 %v2926_v48  ;;  %1574 = vmatmul.mubr.f32.vlgmr.msra.gmra.mrb[14].mxu1 %v2926_v48 }
 0x761   :  { %2300 = vmatpush3.bf16.msra.mxu0 %v2299_v11  ;;  %1783 = vmatprep.mubr.msk.f32.mxu0 %vm2478_vm1, %v2475_v0  ;;  %v1424_v0 = vrot.slane %v1730_v57, %v2656_v24  ;;  %v1733_v24 = vld [vmem:[%s3002_s2 + $0x80] ss:$0 sm:$0xff] }
 0x762   :  { %2301 = vmatprep.subr.bf16.mxu0 %v2477_v13 }
 0x763   :  { %v1432_v62 = vcombine.high %v1424_v0, %v1424_v0 }
 0x765   :  { %2303 = vmatpush3.bf16.msra.mxu0 %v2302_v18 }
 0x766   :  { %2304 = vmatprep.subr.bf16.mxu0 %v2477_v13 }
 0x769   :  { %2306 = vmatpush3.bf16.msra.mxu0 %v2305_v26 }
 0x76a   :  { %2307 = vmatprep.subr.bf16.mxu0 %v2477_v13 }
 0x76d   :  { %2309 = vmatpush3.bf16.msra.mxu0 %v2308_v31 }
 0x76e   :  { %2310 = vmatprep.subr.bf16.mxu0 %v2477_v13 }
 0x771   :  { %2312 = vmatpush3.bf16.msra.mxu0 %v2311_v4 }
 0x772   :  { %2313 = vmatprep.subr.bf16.mxu0 %v2477_v13 }
 0x775   :  { %2315 = vmatpush3.bf16.msra.mxu0 %v2314_v43 }
 0x776   :  { %2316 = vmatprep.subr.bf16.mxu0 %v2477_v13 }
 0x779   :  { %2318 = vmatpush3.bf16.msra.mxu0 %v2317_v50 }
 0x77a   :  { %2319 = vmatprep.subr.bf16.mxu0 %v2477_v13 }
 0x77d   :  { %2321 = vmatpush3.bf16.msra.mxu0 %v2320_v56 }
 0x833   :  { %v1504_v59 = vpop.f32.mrb[14].mxu0  ;;  %v1575_v61 = vpop.f32.mrb[14].mxu1 }
 0x834   :  { %v1505_v63 = vadd.f32 %v1504_v59, %v1424_v0  ;;  %v1506_v1 = vpop.f32.mrb[15].mxu0  ;;  %v1577_v5 = vpop.f32.mrb[15].mxu1  ;;  %v1576_v40 = vadd.f32 %v1575_v61, %v1431_v23 }
 0x835   :  { %v1507_v8 = vadd.f32 %v1506_v1, %v1432_v62  ;;  %v1578_v53 = vadd.f32 %v1577_v5, %v1433_v39 }
 0x836   :  { %v1731_v6 = vmul.f32 -1.442695, %v1505_v63 }
 0x837   :  { %v1732_v9 = vmul.f32 -1.442695, %v1507_v8 }
 0x838   :  { %2414 = vpow2.f32 %v1731_v6 }
 0x839   :  { %2416 = vpow2.f32 %v1732_v9 }
 0x842   :  { %v2415_v14 = vpop.eup %2414 }
 0x843   :  { %v1586_v15 = vadd.f32 1.0, %v2415_v14  ;;  %v2417_v33 = vpop.eup %2416 }
 0x844   :  { %v1587_v34 = vadd.f32 1.0, %v2417_v33 }
 0x845   :  { %2418 = vrcp.f32 %v1586_v15 }
 0x846   :  { %2420 = vrcp.f32 %v1587_v34 }
 0x84f   :  { %v2419_v45 = vpop.eup %2418 }
 0x850   :  { %v1592_v49 = vmul.f32 %v2419_v45, %v1576_v40  ;;  %v2421_v58 = vpop.eup %2420 }
 0x851   :  { %v1595_v60 = vsub.f32 1.0, %v2421_v58  ;;  %v1597_v10 = vmul.f32 %v2421_v58, %v2926_v48 }
 0x852   :  { %v1593_v54 = vadd.f32 %v1592_v49, %v1578_v53 }
 0x854   :  { %2422 = vtanh.f32 %v1593_v54 }
 0x85e   :  { %v2423_v2 = vpop.eup %2422 }
 0x85f   :  { %v1596_v3 = vmul.f32 %v2423_v2, %v1595_v60 }
 0x861   :  { %v1598_v12 = vadd.f32 %v1597_v10, %v1596_v3 }
 0x863   :  { %1784 = vmatmul.mubr.f32.vlgmr.msra.gmra.mrb[16].mxu0 %v1598_v12 }
 0x936   :  { %v1686_v19 = vpop.f32.mrb[16].mxu0 }
 0x937   :  { %v1687_v21 = vadd.f32 %v1733_v24, %v1686_v19  ;;  %v1785_v25 = vpop.f32.mrb[17].mxu0 }
 0x939   :  { %1690 = vst [vmem:[#allocation5] sm:$0x3] %v1687_v21 }
 0x93a   :  { %2457 = shalt.err (!%p2454_p12)
}
 0x93b   :  { %s2458_s1 = scalar_lea.hbm %s3003_s3, 32 }
 0x93c   :  { %p2459_p13 = scmp.ne.s32.totalorder %s3003_s3, %s2458_s1  ;;  %p2462_p0 = scmp.lt.u32.totalorder %s2458_s1, %s3003_s3 }
 0x93e   :  { %p2464_p1 = pnand %p2462_p0, %p2459_p13 }
 0x940   :  { %2467 = shalt.err (!%p2464_p1)
}
 0x941   :  { %1700 = dma.vmem_to_hbm [thread:$0]  %s1698_s22, 32, %s3003_s3, [#allocation4]  }
 0x942   :  { %2470 = dma.done.wait [#allocation4], 32  }
 0x943   :  { %2471 = vsyncadd [#allocation4], 4294967264 }
 0x944   :  { %1704 = vsyncpa [#allocation3], 1 }
 0x945   :  { %1705 = vsyncpa [#allocation4], 1 }

</bundles_post_ra>
